<compile_context>
chip_gen: v7x
topology: tpu7x:2x2x1
jax: 0.10.0
libtpu: 0.0.40
codegen_flags: <defaults>
</compile_context>

<pallas_src>
import functools

import jax
import jax.numpy as jnp
from jax.experimental import pallas as pl
from jax.experimental.pallas import tpu as pltpu


# ----------------------------------------------------------------------------
# Pallas kernel: fused bi-directional cross-attention for a block of windows.
# ----------------------------------------------------------------------------
def _bica_block_kernel(
    x1_ref, x2_ref,
    wqv1_ref, bqv1_ref, wkv2_ref, bkv2_ref,
    wo1_ref, bo1_ref, wo2_ref, bo2_ref,
    g1_ref, g2_ref,
    y1_ref, y2_ref,
    *, num_heads, head_dim, eps,
):
    f32 = jnp.float32
    bf16 = jnp.bfloat16
    wb, s1, c1 = x1_ref.shape
    _, s2, c2 = x2_ref.shape
    hidden = num_heads * head_dim

    x1 = x1_ref[...].astype(f32)          # (Wb, S1, C1) — modality-1 tokens of this block
    x2 = x2_ref[...].astype(f32)          # (Wb, S2, C2) — modality-2 tokens of this block

    def _layernorm(x):                    # affine=False LayerNorm, eps=1e-6, f32 VPU math
        mu = jnp.mean(x, axis=-1, keepdims=True)
        xc = x - mu
        var = jnp.mean(xc * xc, axis=-1, keepdims=True)
        return xc * jax.lax.rsqrt(var + eps)

    # LayerNorm in f32, then cast once to bf16 for the fused MXU projections.
    xn1 = _layernorm(x1).reshape(wb * s1, c1).astype(bf16)
    xn2 = _layernorm(x2).reshape(wb * s2, c2).astype(bf16)

    # Fused projections: [Q | V1] for modality 1, [K | V2] for modality 2.
    # (query scale is pre-folded into wqv1 / bqv1 in the wrapper.)
    qv1 = jnp.dot(xn1, wqv1_ref[...], preferred_element_type=f32) + bqv1_ref[...]
    kv2 = jnp.dot(xn2, wkv2_ref[...], preferred_element_type=f32) + bkv2_ref[...]

    q1 = qv1[:, :hidden].reshape(wb, s1, hidden)
    v1 = qv1[:, hidden:].reshape(wb, s1, hidden)
    k2 = kv2[:, :hidden].reshape(wb, s2, hidden)
    v2 = kv2[:, hidden:].reshape(wb, s2, hidden)

    # Per-head outputs are folded straight into the output projections (no concat,
    # per-head intermediates die immediately -> bounded live ranges).
    dx1 = jnp.zeros((wb * s1, c1), f32)
    dx2 = jnp.zeros((wb * s2, c2), f32)

    for h in range(num_heads):            # static unroll; each head consumed immediately
        lo = h * head_dim
        hi = lo + head_dim
        qh = q1[:, :, lo:hi].astype(bf16)    # (Wb, S1, dH)
        kh = k2[:, :, lo:hi].astype(bf16)    # (Wb, S2, dH)
        v1h = v1[:, :, lo:hi].astype(bf16)
        v2h = v2[:, :, lo:hi].astype(bf16)

        # Shared bi-directional logits, window-batched:  (Wb, S1, S2)
        logits = jax.lax.dot_general(
            qh, kh, (((2,), (2,)), ((0,), (0,))), preferred_element_type=f32)

        # One shared exp for both softmax directions (global max per window/head);
        # the denominator floor guards the (pathological) underflow-to-zero case.
        m = jnp.max(logits, axis=2, keepdims=True)
        m = jnp.max(m, axis=1, keepdims=True)          # (Wb, 1, 1)
        e = jnp.exp(logits - m)                        # single EUP pass
        rsum = jnp.sum(e, axis=2, keepdims=True)       # (Wb, S1, 1)  m1 -> m2 denom
        csum = jnp.sum(e, axis=1, keepdims=True)       # (Wb, 1, S2)  m2 -> m1 denom
        p12 = e * pl.reciprocal(jnp.maximum(rsum, 1e-30), approx=True)
        p21 = e * pl.reciprocal(jnp.maximum(csum, 1e-30), approx=True)

        # m1 attends to m2:  (Wb, S1, dH)
        o1h = jax.lax.dot_general(
            p12.astype(bf16), v2h, (((2,), (1,)), ((0,), (0,))),
            preferred_element_type=f32)
        # m2 attends to m1 without transposing the logits: contract the S1 axis directly.
        o2h = jax.lax.dot_general(
            p21.astype(bf16), v1h, (((1,), (1,)), ((0,), (0,))),
            preferred_element_type=f32)                # (Wb, S2, dH)

        # Fold this head straight into the output projection (rows lo:hi of wo).
        dx1 = dx1 + jnp.dot(o1h.reshape(wb * s1, head_dim).astype(bf16),
                            wo1_ref[lo:hi, :], preferred_element_type=f32)
        dx2 = dx2 + jnp.dot(o2h.reshape(wb * s2, head_dim).astype(bf16),
                            wo2_ref[lo:hi, :], preferred_element_type=f32)

    dx1 = (dx1 + bo1_ref[...]).reshape(wb, s1, c1)
    dx2 = (dx2 + bo2_ref[...]).reshape(wb, s2, c2)

    # drop_path == 0.0 in the reference config -> identity at inference.
    y1_ref[...] = (x1 + g1_ref[...] * dx1).astype(y1_ref.dtype)
    y2_ref[...] = (x2 + g2_ref[...] * dx2).astype(y2_ref.dtype)


# ----------------------------------------------------------------------------
# Wrapper: temporal window slicing, weight fusion/casting + pallas_call.
# ----------------------------------------------------------------------------
def _pick_windows_per_block(n_win, s1, c1, s2, c2, hidden,
                            budget_bytes=8 * 1024 * 1024):
    """Largest divisor of n_win whose live activations fit a VMEM budget (keep grid>=2)."""
    per_win = 4 * (2 * (s1 * c1 + s2 * c2)          # x (f32) + dx accumulators
                   + 2 * (s1 + s2) * hidden          # fused q/v and k/v projections
                   + 3 * s1 * s2)                    # logits + two prob tensors (one head live)
    wb = max(1, int(budget_bytes // max(per_win, 1)))
    if n_win >= 2:
        wb = min(wb, n_win // 2)    # >=2 grid steps so both v7x TensorCores get work
    wb = max(1, min(wb, n_win))
    while n_win % wb:
        wb -= 1
    return wb


def cross_modality_bi_attention_forward(
    x1, x2, params, *, T=None, S=None, R=None, M=None,
    num_heads, bica_mode="temporal", eps=1e-6,
):
    """Forward of CrossModalityBiAttentionBlock (no attention masks)."""
    B, N1, C1 = x1.shape
    B2, N2, C2 = x2.shape
    assert B == B2
    H = params["wq1"].shape[1]
    assert H % num_heads == 0
    head_dim = H // num_heads
    scale = float(head_dim) ** -0.5

    if bica_mode == "temporal":
        assert C1 == C2, "temporal bi-attention requires equal channel dims"
        assert N1 == T * S and N2 == R * M
        # TODO(synk): the padding branch of auto_temporal_slice (R % T != 0) is a
        # data-dependent scatter with per-batch valid counts; only the pad-free
        # case (a pure reshape) is implemented here.
        assert R % T == 0, "only the pad-free temporal slicing path is supported"
        win = R // T
        x1w = x1.reshape(B * T, S, C1)
        x2w = x2.reshape(B * T, win * M, C2)
        S1, S2 = S, win * M
        n_win = B * T
    elif bica_mode == "overall":
        x1w, x2w = x1, x2
        S1, S2 = N1, N2
        n_win = B
    else:
        raise NotImplementedError(bica_mode)

    f32, bf16 = jnp.float32, jnp.bfloat16
    # Fused, query-pre-scaled, bf16 MXU weights (half the weight DMA + VMEM residency,
    # MXU runs at its bf16 rate).  Biases / gammas stay f32 (VPU adds only).
    # For best TPU layout C1/C2/H should be multiples of 128 (lane-dense stores).
    wqv1 = jnp.concatenate([params["wq1"] * scale, params["wv1"]], axis=1).astype(bf16)
    bqv1 = jnp.concatenate([params["bq1"] * scale, params["bv1"]]).reshape(1, 2 * H).astype(f32)
    wkv2 = jnp.concatenate([params["wk2"], params["wv2"]], axis=1).astype(bf16)
    bkv2 = jnp.concatenate([params["bk2"], params["bv2"]]).reshape(1, 2 * H).astype(f32)
    wo1 = params["wo1"].astype(bf16)
    wo2 = params["wo2"].astype(bf16)
    bo1 = params["bo1"].reshape(1, C1).astype(f32)
    bo2 = params["bo2"].reshape(1, C2).astype(f32)
    g1 = params["gamma_m1"].reshape(1, C1).astype(f32)
    g2 = params["gamma_m2"].reshape(1, C2).astype(f32)

    Wb = _pick_windows_per_block(n_win, S1, C1, S2, C2, H)
    grid = (n_win // Wb,)

    kernel = functools.partial(
        _bica_block_kernel, num_heads=num_heads, head_dim=head_dim, eps=eps)

    win_spec_1 = pl.BlockSpec((Wb, S1, C1), lambda i: (i, 0, 0))
    win_spec_2 = pl.BlockSpec((Wb, S2, C2), lambda i: (i, 0, 0))

    def _full(a):
        # Whole (small) weight array resident; constant index_map -> fetched once, no re-DMA.
        # TODO(synk): at production hidden sizes on v7x, add pipeline_mode=pl.Buffered(1)
        # here so the resident weights are single-buffered (64 MiB VMEM per core).
        return pl.BlockSpec(a.shape, lambda i: (0,) * a.ndim)

    def _nbytes(a):
        return a.size * a.dtype.itemsize

    flops = int(
        2 * n_win * S1 * C1 * (2 * H) + 2 * n_win * S2 * C2 * (2 * H)   # fused QV / KV proj
        + 6 * n_win * S1 * S2 * H                                        # logits + both AV
        + 2 * n_win * S1 * H * C1 + 2 * n_win * S2 * H * C2)             # output projections
    transcendentals = int(n_win * num_heads * S1 * S2                    # shared exp
                          + n_win * num_heads * (S1 + S2)                # approx reciprocals
                          + n_win * (S1 + S2))                           # LayerNorm rsqrt
    bytes_accessed = int(
        2 * (_nbytes(x1w) + _nbytes(x2w))
        + sum(_nbytes(a) for a in (wqv1, bqv1, wkv2, bkv2, wo1, bo1, wo2, bo2, g1, g2)))

    y1w, y2w = pl.pallas_call(
        kernel,
        out_shape=(
            jax.ShapeDtypeStruct(x1w.shape, x1.dtype),
            jax.ShapeDtypeStruct(x2w.shape, x2.dtype),
        ),
        grid_spec=pltpu.PrefetchScalarGridSpec(
            num_scalar_prefetch=0,
            grid=grid,
            in_specs=[
                win_spec_1, win_spec_2,
                _full(wqv1), _full(bqv1), _full(wkv2), _full(bkv2),
                _full(wo1), _full(bo1), _full(wo2), _full(bo2),
                _full(g1), _full(g2),
            ],
            out_specs=(win_spec_1, win_spec_2),
        ),
        compiler_params=pltpu.CompilerParams(
            dimension_semantics=("parallel",),      # window blocks shard across TCs on v7x
            vmem_limit_bytes=48 * 1024 * 1024,      # above default scoped limit, safe on v5e–v7x
        ),
        cost_estimate=pl.CostEstimate(
            flops=flops, transcendentals=transcendentals, bytes_accessed=bytes_accessed),
    )(x1w, x2w, wqv1, bqv1, wkv2, bkv2, wo1, bo1, wo2, bo2, g1, g2)

    return y1w.reshape(B, N1, C1), y2w.reshape(B, N2, C2)


# ----------------------------------------------------------------------------
# Pure-JAX reference (f32, for correctness checking).
# ----------------------------------------------------------------------------
def _reference_forward(x1, x2, params, *, T, S, R, M, num_heads,
                       bica_mode="temporal", eps=1e-6):
    B, N1, C1 = x1.shape
    _, N2, C2 = x2.shape
    H = params["wq1"].shape[1]
    dH = H // num_heads

    if bica_mode == "temporal":
        win = R // T
        x1w = x1.reshape(B * T, S, C1)
        x2w = x2.reshape(B * T, win * M, C2)
    else:
        x1w, x2w = x1, x2

    def ln(x):
        mu = jnp.mean(x, axis=-1, keepdims=True)
        var = jnp.mean((x - mu) ** 2, axis=-1, keepdims=True)
        return (x - mu) / jnp.sqrt(var + eps)

    xn1 = ln(x1w.astype(jnp.float32))
    xn2 = ln(x2w.astype(jnp.float32))

    scale = 1.0 / (dH ** 0.5)
    q1 = (xn1 @ params["wq1"] + params["bq1"]) * scale
    k2 = xn2 @ params["wk2"] + params["bk2"]
    v1 = xn1 @ params["wv1"] + params["bv1"]
    v2 = xn2 @ params["wv2"] + params["bv2"]

    BT, S1, _ = xn1.shape
    S2 = xn2.shape[1]
    q1h = q1.reshape(BT, S1, num_heads, dH)
    k2h = k2.reshape(BT, S2, num_heads, dH)
    v1h = v1.reshape(BT, S1, num_heads, dH)
    v2h = v2.reshape(BT, S2, num_heads, dH)

    logits = jnp.einsum("bqhd,bkhd->bhqk", q1h, k2h)
    p12 = jax.nn.softmax(logits, axis=-1)
    p21 = jax.nn.softmax(jnp.swapaxes(logits, -1, -2), axis=-1)
    o1 = jnp.einsum("bhqk,bkhd->bqhd", p12, v2h).reshape(BT, S1, H)
    o2 = jnp.einsum("bhkq,bqhd->bkhd", p21, v1h).reshape(BT, S2, H)

    dx1 = o1 @ params["wo1"] + params["bo1"]
    dx2 = o2 @ params["wo2"] + params["bo2"]

    y1 = x1w.astype(jnp.float32) + params["gamma_m1"] * dx1
    y2 = x2w.astype(jnp.float32) + params["gamma_m2"] * dx2
    return (y1.reshape(B, N1, C1).astype(x1.dtype),
            y2.reshape(B, N2, C2).astype(x2.dtype))


# ----------------------------------------------------------------------------
# Deterministic parameter init (BiMultiHeadAttention projections + gammas).
# ----------------------------------------------------------------------------
def init_params(key, m1_dim, m2_dim, hidden_size, num_heads, init_values=1e-4):
    del num_heads
    ks = jax.random.split(key, 6)

    def lin(k, fan_in, fan_out):
        return jax.random.normal(k, (fan_in, fan_out), jnp.float32) * 0.02

    return {
        # m1 -> query / m1-value, m2 -> key / m2-value (GLIP-style bi-attention).
        "wq1": lin(ks[0], m1_dim, hidden_size), "bq1": jnp.zeros((hidden_size,), jnp.float32),
        "wk2": lin(ks[1], m2_dim, hidden_size), "bk2": jnp.zeros((hidden_size,), jnp.float32),
        "wv1": lin(ks[2], m1_dim, hidden_size), "bv1": jnp.zeros((hidden_size,), jnp.float32),
        "wv2": lin(ks[3], m2_dim, hidden_size), "bv2": jnp.zeros((hidden_size,), jnp.float32),
        "wo1": lin(ks[4], hidden_size, m1_dim), "bo1": jnp.zeros((m1_dim,), jnp.float32),
        "wo2": lin(ks[5], hidden_size, m2_dim), "bo2": jnp.zeros((m2_dim,), jnp.float32),
        # gamma_m1 / gamma_m2 = init_values * ones
        "gamma_m1": jnp.full((m1_dim,), init_values, jnp.float32),
        "gamma_m2": jnp.full((m2_dim,), init_values, jnp.float32),
        # attn_norm_m1 / attn_norm_m2: affine=False LayerNorms -> no parameters.
    }


# ----------------------------------------------------------------------------
# Main
# ----------------------------------------------------------------------------
if __name__ == "__main__":
    # Temporal mode: x1 (B, T*S, C) video tokens, x2 (B, R*M, C) audio tokens, R % T == 0.
    # Small shapes, chosen lane-dense (C, hidden, head_dim are multiples of 128).
    B, T, S, R, M = 2, 2, 32, 4, 16
    m_dim, hidden_size, num_heads = 128, 256, 2

    key = jax.random.PRNGKey(0)
    kp, k1, k2 = jax.random.split(key, 3)
    # init_values enlarged from the module default 1e-4 so the attention path is actually
    # exercised by the numeric check (gamma is a free learnable parameter).
    params = init_params(kp, m_dim, m_dim, hidden_size, num_heads, init_values=0.5)
    x1 = jax.random.normal(k1, (B, T * S, m_dim), jnp.float32)
    x2 = jax.random.normal(k2, (B, R * M, m_dim), jnp.float32)

    fwd = jax.jit(functools.partial(
        cross_modality_bi_attention_forward,
        T=T, S=S, R=R, M=M, num_heads=num_heads, bica_mode="temporal"))
    y1, y2 = fwd(x1, x2, params)
    y1, y2 = jax.block_until_ready((y1, y2))

    r1, r2 = _reference_forward(x1, x2, params, T=T, S=S, R=R, M=M, num_heads=num_heads)
    assert y1.shape == x1.shape and y2.shape == x2.shape
    # bf16 MXU operands + approx reciprocal -> compare against the f32 reference loosely.
    assert bool(jnp.allclose(y1, r1, rtol=1e-2, atol=2e-3)), float(jnp.abs(y1 - r1).max())
    assert bool(jnp.allclose(y2, r2, rtol=1e-2, atol=2e-3)), float(jnp.abs(y2 - r2).max())

    print("KERNEL_OK")
</pallas_src>

<mosaic_0001>
module attributes {stable_mosaic.version = 11 : i64} {
  func.func @_bica_block_kernel(%arg0: i32, %arg1: memref<2x32x128xf32, #tpu.memory_space<vmem>>, %arg2: memref<2x32x128xf32, #tpu.memory_space<vmem>>, %arg3: memref<128x512xbf16, #tpu.memory_space<vmem>>, %arg4: memref<1x512xf32, #tpu.memory_space<vmem>>, %arg5: memref<128x512xbf16, #tpu.memory_space<vmem>>, %arg6: memref<1x512xf32, #tpu.memory_space<vmem>>, %arg7: memref<256x128xbf16, #tpu.memory_space<vmem>>, %arg8: memref<1x128xf32, #tpu.memory_space<vmem>>, %arg9: memref<256x128xbf16, #tpu.memory_space<vmem>>, %arg10: memref<1x128xf32, #tpu.memory_space<vmem>>, %arg11: memref<1x128xf32, #tpu.memory_space<vmem>>, %arg12: memref<1x128xf32, #tpu.memory_space<vmem>>, %arg13: memref<2x32x128xf32, #tpu.memory_space<vmem>>, %arg14: memref<2x32x128xf32, #tpu.memory_space<vmem>>) attributes {dimension_semantics = [#tpu.dimension_semantics<parallel>], iteration_bounds = array<i64: 2>, scalar_prefetch = 0 : i64, scratch_operands = 0 : i64, tpu.core_type = #tpu.core_type<tc>, window_params = [{transform_indices = @transform_0, window_bounds = array<i64: 2, 32, 128>}, {transform_indices = @transform_1, window_bounds = array<i64: 2, 32, 128>}, {pipeline_mode = #tpu.pipeline_mode<synchronous>, transform_indices = @transform_2, window_bounds = array<i64: 128, 512>}, {pipeline_mode = #tpu.pipeline_mode<synchronous>, transform_indices = @transform_3, window_bounds = array<i64: 1, 512>}, {pipeline_mode = #tpu.pipeline_mode<synchronous>, transform_indices = @transform_4, window_bounds = array<i64: 128, 512>}, {pipeline_mode = #tpu.pipeline_mode<synchronous>, transform_indices = @transform_5, window_bounds = array<i64: 1, 512>}, {pipeline_mode = #tpu.pipeline_mode<synchronous>, transform_indices = @transform_6, window_bounds = array<i64: 256, 128>}, {pipeline_mode = #tpu.pipeline_mode<synchronous>, transform_indices = @transform_7, window_bounds = array<i64: 1, 128>}, {pipeline_mode = #tpu.pipeline_mode<synchronous>, transform_indices = @transform_8, window_bounds = array<i64: 256, 128>}, {pipeline_mode = #tpu.pipeline_mode<synchronous>, transform_indices = @transform_9, window_bounds = array<i64: 1, 128>}, {pipeline_mode = #tpu.pipeline_mode<synchronous>, transform_indices = @transform_10, window_bounds = array<i64: 1, 128>}, {pipeline_mode = #tpu.pipeline_mode<synchronous>, transform_indices = @transform_11, window_bounds = array<i64: 1, 128>}, {transform_indices = @transform_12, window_bounds = array<i64: 2, 32, 128>}, {transform_indices = @transform_13, window_bounds = array<i64: 2, 32, 128>}]} {
    %c0 = arith.constant 0 : index
    %c0_0 = arith.constant 0 : index
    %c0_1 = arith.constant 0 : index
    %0 = vector.load %arg1[%c0, %c0_0, %c0_1] : memref<2x32x128xf32, #tpu.memory_space<vmem>>, vector<2x32x128xf32>
    %c0_2 = arith.constant 0 : index
    %c0_3 = arith.constant 0 : index
    %c0_4 = arith.constant 0 : index
    %1 = vector.load %arg2[%c0_2, %c0_3, %c0_4] : memref<2x32x128xf32, #tpu.memory_space<vmem>>, vector<2x32x128xf32>
    %cst = arith.constant dense<0.000000e+00> : vector<2x32xf32>
    %2 = vector.multi_reduction <add>, %0, %cst [2] : vector<2x32x128xf32> to vector<2x32xf32>
    %3 = vector.shape_cast %2 : vector<2x32xf32> to vector<2x32x1xf32>
    %cst_5 = arith.constant 1.280000e+02 : f32
    %4 = vector.broadcast %cst_5 : f32 to vector<2x32x1xf32>
    %5 = arith.divf %3, %4 : vector<2x32x1xf32>
    %6 = vector.broadcast %5 : vector<2x32x1xf32> to vector<2x32x128xf32>
    %7 = arith.subf %0, %6 : vector<2x32x128xf32>
    %8 = arith.mulf %7, %7 : vector<2x32x128xf32>
    %cst_6 = arith.constant dense<0.000000e+00> : vector<2x32xf32>
    %9 = vector.multi_reduction <add>, %8, %cst_6 [2] : vector<2x32x128xf32> to vector<2x32xf32>
    %10 = vector.shape_cast %9 : vector<2x32xf32> to vector<2x32x1xf32>
    %cst_7 = arith.constant 1.280000e+02 : f32
    %11 = vector.broadcast %cst_7 : f32 to vector<2x32x1xf32>
    %12 = arith.divf %10, %11 : vector<2x32x1xf32>
    %cst_8 = arith.constant 9.99999997E-7 : f32
    %13 = vector.broadcast %cst_8 : f32 to vector<2x32x1xf32>
    %14 = arith.addf %12, %13 : vector<2x32x1xf32>
    %15 = math.rsqrt %14 : vector<2x32x1xf32>
    %16 = vector.broadcast %15 : vector<2x32x1xf32> to vector<2x32x128xf32>
    %17 = arith.mulf %7, %16 : vector<2x32x128xf32>
    %18 = vector.shape_cast %17 : vector<2x32x128xf32> to vector<64x128xf32>
    %19 = arith.truncf %18 : vector<64x128xf32> to vector<64x128xbf16>
    %cst_9 = arith.constant dense<0.000000e+00> : vector<2x32xf32>
    %20 = vector.multi_reduction <add>, %1, %cst_9 [2] : vector<2x32x128xf32> to vector<2x32xf32>
    %21 = vector.shape_cast %20 : vector<2x32xf32> to vector<2x32x1xf32>
    %cst_10 = arith.constant 1.280000e+02 : f32
    %22 = vector.broadcast %cst_10 : f32 to vector<2x32x1xf32>
    %23 = arith.divf %21, %22 : vector<2x32x1xf32>
    %24 = vector.broadcast %23 : vector<2x32x1xf32> to vector<2x32x128xf32>
    %25 = arith.subf %1, %24 : vector<2x32x128xf32>
    %26 = arith.mulf %25, %25 : vector<2x32x128xf32>
    %cst_11 = arith.constant dense<0.000000e+00> : vector<2x32xf32>
    %27 = vector.multi_reduction <add>, %26, %cst_11 [2] : vector<2x32x128xf32> to vector<2x32xf32>
    %28 = vector.shape_cast %27 : vector<2x32xf32> to vector<2x32x1xf32>
    %cst_12 = arith.constant 1.280000e+02 : f32
    %29 = vector.broadcast %cst_12 : f32 to vector<2x32x1xf32>
    %30 = arith.divf %28, %29 : vector<2x32x1xf32>
    %cst_13 = arith.constant 9.99999997E-7 : f32
    %31 = vector.broadcast %cst_13 : f32 to vector<2x32x1xf32>
    %32 = arith.addf %30, %31 : vector<2x32x1xf32>
    %33 = math.rsqrt %32 : vector<2x32x1xf32>
    %34 = vector.broadcast %33 : vector<2x32x1xf32> to vector<2x32x128xf32>
    %35 = arith.mulf %25, %34 : vector<2x32x128xf32>
    %36 = vector.shape_cast %35 : vector<2x32x128xf32> to vector<64x128xf32>
    %37 = arith.truncf %36 : vector<64x128xf32> to vector<64x128xbf16>
    %c0_14 = arith.constant 0 : index
    %c0_15 = arith.constant 0 : index
    %38 = vector.load %arg3[%c0_14, %c0_15] : memref<128x512xbf16, #tpu.memory_space<vmem>>, vector<128x512xbf16>
    %cst_16 = arith.constant dense<0.000000e+00> : vector<64x512xf32>
    %39 = tpu.matmul %19, %38, %cst_16 {dimension_numbers = #tpu.dot_dimension_numbers<[1], [0], [0], [1], [0, 0, 1, 1], [], []>} : vector<64x128xbf16>, vector<128x512xbf16>, vector<64x512xf32> -> vector<64x512xf32>
    %c0_17 = arith.constant 0 : index
    %c0_18 = arith.constant 0 : index
    %40 = vector.load %arg4[%c0_17, %c0_18] : memref<1x512xf32, #tpu.memory_space<vmem>>, vector<1x512xf32>
    %41 = vector.broadcast %40 : vector<1x512xf32> to vector<64x512xf32>
    %42 = arith.addf %39, %41 : vector<64x512xf32>
    %c0_19 = arith.constant 0 : index
    %c0_20 = arith.constant 0 : index
    %43 = vector.load %arg5[%c0_19, %c0_20] : memref<128x512xbf16, #tpu.memory_space<vmem>>, vector<128x512xbf16>
    %cst_21 = arith.constant dense<0.000000e+00> : vector<64x512xf32>
    %44 = tpu.matmul %37, %43, %cst_21 {dimension_numbers = #tpu.dot_dimension_numbers<[1], [0], [0], [1], [0, 0, 1, 1], [], []>} : vector<64x128xbf16>, vector<128x512xbf16>, vector<64x512xf32> -> vector<64x512xf32>
    %c0_22 = arith.constant 0 : index
    %c0_23 = arith.constant 0 : index
    %45 = vector.load %arg6[%c0_22, %c0_23] : memref<1x512xf32, #tpu.memory_space<vmem>>, vector<1x512xf32>
    %46 = vector.broadcast %45 : vector<1x512xf32> to vector<64x512xf32>
    %47 = arith.addf %44, %46 : vector<64x512xf32>
    %48 = vector.extract_strided_slice %42 {offsets = [0, 0], sizes = [64, 256], strides = [1, 1]} : vector<64x512xf32> to vector<64x256xf32>
    %49 = vector.shape_cast %48 : vector<64x256xf32> to vector<2x32x256xf32>
    %50 = vector.extract_strided_slice %42 {offsets = [0, 256], sizes = [64, 256], strides = [1, 1]} : vector<64x512xf32> to vector<64x256xf32>
    %51 = vector.shape_cast %50 : vector<64x256xf32> to vector<2x32x256xf32>
    %52 = vector.extract_strided_slice %47 {offsets = [0, 0], sizes = [64, 256], strides = [1, 1]} : vector<64x512xf32> to vector<64x256xf32>
    %53 = vector.shape_cast %52 : vector<64x256xf32> to vector<2x32x256xf32>
    %54 = vector.extract_strided_slice %47 {offsets = [0, 256], sizes = [64, 256], strides = [1, 1]} : vector<64x512xf32> to vector<64x256xf32>
    %55 = vector.shape_cast %54 : vector<64x256xf32> to vector<2x32x256xf32>
    %cst_24 = arith.constant 0.000000e+00 : f32
    %56 = vector.broadcast %cst_24 : f32 to vector<64x128xf32>
    %cst_25 = arith.constant 0.000000e+00 : f32
    %57 = vector.broadcast %cst_25 : f32 to vector<64x128xf32>
    %58 = vector.extract_strided_slice %49 {offsets = [0, 0, 0], sizes = [2, 32, 128], strides = [1, 1, 1]} : vector<2x32x256xf32> to vector<2x32x128xf32>
    %59 = arith.truncf %58 : vector<2x32x128xf32> to vector<2x32x128xbf16>
    %60 = vector.extract_strided_slice %53 {offsets = [0, 0, 0], sizes = [2, 32, 128], strides = [1, 1, 1]} : vector<2x32x256xf32> to vector<2x32x128xf32>
    %61 = arith.truncf %60 : vector<2x32x128xf32> to vector<2x32x128xbf16>
    %62 = vector.extract_strided_slice %51 {offsets = [0, 0, 0], sizes = [2, 32, 128], strides = [1, 1, 1]} : vector<2x32x256xf32> to vector<2x32x128xf32>
    %63 = arith.truncf %62 : vector<2x32x128xf32> to vector<2x32x128xbf16>
    %64 = vector.extract_strided_slice %55 {offsets = [0, 0, 0], sizes = [2, 32, 128], strides = [1, 1, 1]} : vector<2x32x256xf32> to vector<2x32x128xf32>
    %65 = arith.truncf %64 : vector<2x32x128xf32> to vector<2x32x128xbf16>
    %cst_26 = arith.constant dense<0.000000e+00> : vector<2x32x32xf32>
    %66 = tpu.matmul %59, %61, %cst_26 {dimension_numbers = #tpu.dot_dimension_numbers<[2], [2], [1], [1], [0, 0, 0, 1, 1, 1], [0], [0]>} : vector<2x32x128xbf16>, vector<2x32x128xbf16>, vector<2x32x32xf32> -> vector<2x32x32xf32>
    %cst_27 = arith.constant dense<0xFF800000> : vector<2x32xf32>
    %67 = vector.multi_reduction <maximumf>, %66, %cst_27 [2] : vector<2x32x32xf32> to vector<2x32xf32>
    %68 = vector.shape_cast %67 : vector<2x32xf32> to vector<2x32x1xf32>
    %cst_28 = arith.constant dense<0xFF800000> : vector<2x1xf32>
    %69 = vector.multi_reduction <maximumf>, %68, %cst_28 [1] : vector<2x32x1xf32> to vector<2x1xf32>
    %70 = vector.shape_cast %69 : vector<2x1xf32> to vector<2x1x1xf32>
    %71 = vector.broadcast %70 : vector<2x1x1xf32> to vector<2x32x32xf32>
    %72 = arith.subf %66, %71 : vector<2x32x32xf32>
    %73 = math.exp %72 : vector<2x32x32xf32>
    %cst_29 = arith.constant dense<0.000000e+00> : vector<2x32xf32>
    %74 = vector.multi_reduction <add>, %73, %cst_29 [2] : vector<2x32x32xf32> to vector<2x32xf32>
    %75 = vector.shape_cast %74 : vector<2x32xf32> to vector<2x32x1xf32>
    %cst_30 = arith.constant dense<0.000000e+00> : vector<2x32xf32>
    %76 = vector.multi_reduction <add>, %73, %cst_30 [1] : vector<2x32x32xf32> to vector<2x32xf32>
    %77 = vector.shape_cast %76 : vector<2x32xf32> to vector<2x1x32xf32>
    %cst_31 = arith.constant 1.000000e-30 : f32
    %78 = vector.broadcast %cst_31 : f32 to vector<2x32x1xf32>
    %79 = arith.maximumf %75, %78 : vector<2x32x1xf32>
    %80 = tpu.reciprocal %79 {approx = true} : vector<2x32x1xf32> -> vector<2x32x1xf32>
    %81 = vector.broadcast %80 : vector<2x32x1xf32> to vector<2x32x32xf32>
    %82 = arith.mulf %73, %81 : vector<2x32x32xf32>
    %cst_32 = arith.constant 1.000000e-30 : f32
    %83 = vector.broadcast %cst_32 : f32 to vector<2x1x32xf32>
    %84 = arith.maximumf %77, %83 : vector<2x1x32xf32>
    %85 = tpu.reciprocal %84 {approx = true} : vector<2x1x32xf32> -> vector<2x1x32xf32>
    %86 = vector.broadcast %85 : vector<2x1x32xf32> to vector<2x32x32xf32>
    %87 = arith.mulf %73, %86 : vector<2x32x32xf32>
    %88 = arith.truncf %82 : vector<2x32x32xf32> to vector<2x32x32xbf16>
    %cst_33 = arith.constant dense<0.000000e+00> : vector<2x32x128xf32>
    %89 = tpu.matmul %88, %65, %cst_33 {dimension_numbers = #tpu.dot_dimension_numbers<[2], [1], [1], [2], [0, 0, 0, 1, 1, 2], [0], [0]>} : vector<2x32x32xbf16>, vector<2x32x128xbf16>, vector<2x32x128xf32> -> vector<2x32x128xf32>
    %90 = arith.truncf %87 : vector<2x32x32xf32> to vector<2x32x32xbf16>
    %cst_34 = arith.constant dense<0.000000e+00> : vector<2x32x128xf32>
    %91 = tpu.matmul %90, %63, %cst_34 {dimension_numbers = #tpu.dot_dimension_numbers<[1], [1], [2], [2], [0, 0, 0, 2, 1, 2], [0], [0]>} : vector<2x32x32xbf16>, vector<2x32x128xbf16>, vector<2x32x128xf32> -> vector<2x32x128xf32>
    %92 = vector.shape_cast %89 : vector<2x32x128xf32> to vector<64x128xf32>
    %93 = arith.truncf %92 : vector<64x128xf32> to vector<64x128xbf16>
    %c0_35 = arith.constant 0 : index
    %c0_36 = arith.constant 0 : index
    %94 = vector.load %arg7[%c0_35, %c0_36] : memref<256x128xbf16, #tpu.memory_space<vmem>>, vector<128x128xbf16>
    %cst_37 = arith.constant dense<0.000000e+00> : vector<64x128xf32>
    %95 = tpu.matmul %93, %94, %cst_37 {dimension_numbers = #tpu.dot_dimension_numbers<[1], [0], [0], [1], [0, 0, 1, 1], [], []>} : vector<64x128xbf16>, vector<128x128xbf16>, vector<64x128xf32> -> vector<64x128xf32>
    %96 = arith.addf %56, %95 : vector<64x128xf32>
    %97 = vector.shape_cast %91 : vector<2x32x128xf32> to vector<64x128xf32>
    %98 = arith.truncf %97 : vector<64x128xf32> to vector<64x128xbf16>
    %c0_38 = arith.constant 0 : index
    %c0_39 = arith.constant 0 : index
    %99 = vector.load %arg9[%c0_38, %c0_39] : memref<256x128xbf16, #tpu.memory_space<vmem>>, vector<128x128xbf16>
    %cst_40 = arith.constant dense<0.000000e+00> : vector<64x128xf32>
    %100 = tpu.matmul %98, %99, %cst_40 {dimension_numbers = #tpu.dot_dimension_numbers<[1], [0], [0], [1], [0, 0, 1, 1], [], []>} : vector<64x128xbf16>, vector<128x128xbf16>, vector<64x128xf32> -> vector<64x128xf32>
    %101 = arith.addf %57, %100 : vector<64x128xf32>
    %102 = vector.extract_strided_slice %49 {offsets = [0, 0, 128], sizes = [2, 32, 128], strides = [1, 1, 1]} : vector<2x32x256xf32> to vector<2x32x128xf32>
    %103 = arith.truncf %102 : vector<2x32x128xf32> to vector<2x32x128xbf16>
    %104 = vector.extract_strided_slice %53 {offsets = [0, 0, 128], sizes = [2, 32, 128], strides = [1, 1, 1]} : vector<2x32x256xf32> to vector<2x32x128xf32>
    %105 = arith.truncf %104 : vector<2x32x128xf32> to vector<2x32x128xbf16>
    %106 = vector.extract_strided_slice %51 {offsets = [0, 0, 128], sizes = [2, 32, 128], strides = [1, 1, 1]} : vector<2x32x256xf32> to vector<2x32x128xf32>
    %107 = arith.truncf %106 : vector<2x32x128xf32> to vector<2x32x128xbf16>
    %108 = vector.extract_strided_slice %55 {offsets = [0, 0, 128], sizes = [2, 32, 128], strides = [1, 1, 1]} : vector<2x32x256xf32> to vector<2x32x128xf32>
    %109 = arith.truncf %108 : vector<2x32x128xf32> to vector<2x32x128xbf16>
    %cst_41 = arith.constant dense<0.000000e+00> : vector<2x32x32xf32>
    %110 = tpu.matmul %103, %105, %cst_41 {dimension_numbers = #tpu.dot_dimension_numbers<[2], [2], [1], [1], [0, 0, 0, 1, 1, 1], [0], [0]>} : vector<2x32x128xbf16>, vector<2x32x128xbf16>, vector<2x32x32xf32> -> vector<2x32x32xf32>
    %cst_42 = arith.constant dense<0xFF800000> : vector<2x32xf32>
    %111 = vector.multi_reduction <maximumf>, %110, %cst_42 [2] : vector<2x32x32xf32> to vector<2x32xf32>
    %112 = vector.shape_cast %111 : vector<2x32xf32> to vector<2x32x1xf32>
    %cst_43 = arith.constant dense<0xFF800000> : vector<2x1xf32>
    %113 = vector.multi_reduction <maximumf>, %112, %cst_43 [1] : vector<2x32x1xf32> to vector<2x1xf32>
    %114 = vector.shape_cast %113 : vector<2x1xf32> to vector<2x1x1xf32>
    %115 = vector.broadcast %114 : vector<2x1x1xf32> to vector<2x32x32xf32>
    %116 = arith.subf %110, %115 : vector<2x32x32xf32>
    %117 = math.exp %116 : vector<2x32x32xf32>
    %cst_44 = arith.constant dense<0.000000e+00> : vector<2x32xf32>
    %118 = vector.multi_reduction <add>, %117, %cst_44 [2] : vector<2x32x32xf32> to vector<2x32xf32>
    %119 = vector.shape_cast %118 : vector<2x32xf32> to vector<2x32x1xf32>
    %cst_45 = arith.constant dense<0.000000e+00> : vector<2x32xf32>
    %120 = vector.multi_reduction <add>, %117, %cst_45 [1] : vector<2x32x32xf32> to vector<2x32xf32>
    %121 = vector.shape_cast %120 : vector<2x32xf32> to vector<2x1x32xf32>
    %cst_46 = arith.constant 1.000000e-30 : f32
    %122 = vector.broadcast %cst_46 : f32 to vector<2x32x1xf32>
    %123 = arith.maximumf %119, %122 : vector<2x32x1xf32>
    %124 = tpu.reciprocal %123 {approx = true} : vector<2x32x1xf32> -> vector<2x32x1xf32>
    %125 = vector.broadcast %124 : vector<2x32x1xf32> to vector<2x32x32xf32>
    %126 = arith.mulf %117, %125 : vector<2x32x32xf32>
    %cst_47 = arith.constant 1.000000e-30 : f32
    %127 = vector.broadcast %cst_47 : f32 to vector<2x1x32xf32>
    %128 = arith.maximumf %121, %127 : vector<2x1x32xf32>
    %129 = tpu.reciprocal %128 {approx = true} : vector<2x1x32xf32> -> vector<2x1x32xf32>
    %130 = vector.broadcast %129 : vector<2x1x32xf32> to vector<2x32x32xf32>
    %131 = arith.mulf %117, %130 : vector<2x32x32xf32>
    %132 = arith.truncf %126 : vector<2x32x32xf32> to vector<2x32x32xbf16>
    %cst_48 = arith.constant dense<0.000000e+00> : vector<2x32x128xf32>
    %133 = tpu.matmul %132, %109, %cst_48 {dimension_numbers = #tpu.dot_dimension_numbers<[2], [1], [1], [2], [0, 0, 0, 1, 1, 2], [0], [0]>} : vector<2x32x32xbf16>, vector<2x32x128xbf16>, vector<2x32x128xf32> -> vector<2x32x128xf32>
    %134 = arith.truncf %131 : vector<2x32x32xf32> to vector<2x32x32xbf16>
    %cst_49 = arith.constant dense<0.000000e+00> : vector<2x32x128xf32>
    %135 = tpu.matmul %134, %107, %cst_49 {dimension_numbers = #tpu.dot_dimension_numbers<[1], [1], [2], [2], [0, 0, 0, 2, 1, 2], [0], [0]>} : vector<2x32x32xbf16>, vector<2x32x128xbf16>, vector<2x32x128xf32> -> vector<2x32x128xf32>
    %136 = vector.shape_cast %133 : vector<2x32x128xf32> to vector<64x128xf32>
    %137 = arith.truncf %136 : vector<64x128xf32> to vector<64x128xbf16>
    %c128 = arith.constant 128 : index
    %c0_50 = arith.constant 0 : index
    %138 = vector.load %arg7[%c128, %c0_50] : memref<256x128xbf16, #tpu.memory_space<vmem>>, vector<128x128xbf16>
    %cst_51 = arith.constant dense<0.000000e+00> : vector<64x128xf32>
    %139 = tpu.matmul %137, %138, %cst_51 {dimension_numbers = #tpu.dot_dimension_numbers<[1], [0], [0], [1], [0, 0, 1, 1], [], []>} : vector<64x128xbf16>, vector<128x128xbf16>, vector<64x128xf32> -> vector<64x128xf32>
    %140 = arith.addf %96, %139 : vector<64x128xf32>
    %141 = vector.shape_cast %135 : vector<2x32x128xf32> to vector<64x128xf32>
    %142 = arith.truncf %141 : vector<64x128xf32> to vector<64x128xbf16>
    %c128_52 = arith.constant 128 : index
    %c0_53 = arith.constant 0 : index
    %143 = vector.load %arg9[%c128_52, %c0_53] : memref<256x128xbf16, #tpu.memory_space<vmem>>, vector<128x128xbf16>
    %cst_54 = arith.constant dense<0.000000e+00> : vector<64x128xf32>
    %144 = tpu.matmul %142, %143, %cst_54 {dimension_numbers = #tpu.dot_dimension_numbers<[1], [0], [0], [1], [0, 0, 1, 1], [], []>} : vector<64x128xbf16>, vector<128x128xbf16>, vector<64x128xf32> -> vector<64x128xf32>
    %145 = arith.addf %101, %144 : vector<64x128xf32>
    %c0_55 = arith.constant 0 : index
    %c0_56 = arith.constant 0 : index
    %146 = vector.load %arg8[%c0_55, %c0_56] : memref<1x128xf32, #tpu.memory_space<vmem>>, vector<1x128xf32>
    %147 = vector.broadcast %146 : vector<1x128xf32> to vector<64x128xf32>
    %148 = arith.addf %140, %147 : vector<64x128xf32>
    %149 = vector.shape_cast %148 : vector<64x128xf32> to vector<2x32x128xf32>
    %c0_57 = arith.constant 0 : index
    %c0_58 = arith.constant 0 : index
    %150 = vector.load %arg10[%c0_57, %c0_58] : memref<1x128xf32, #tpu.memory_space<vmem>>, vector<1x128xf32>
    %151 = vector.broadcast %150 : vector<1x128xf32> to vector<64x128xf32>
    %152 = arith.addf %145, %151 : vector<64x128xf32>
    %153 = vector.shape_cast %152 : vector<64x128xf32> to vector<2x32x128xf32>
    %c0_59 = arith.constant 0 : index
    %c0_60 = arith.constant 0 : index
    %154 = vector.load %arg11[%c0_59, %c0_60] : memref<1x128xf32, #tpu.memory_space<vmem>>, vector<1x128xf32>
    %155 = vector.shape_cast %154 : vector<1x128xf32> to vector<1x1x128xf32>
    %156 = vector.broadcast %155 : vector<1x1x128xf32> to vector<2x32x128xf32>
    %157 = arith.mulf %156, %149 : vector<2x32x128xf32>
    %158 = arith.addf %0, %157 : vector<2x32x128xf32>
    %c0_61 = arith.constant 0 : index
    %c0_62 = arith.constant 0 : index
    %c0_63 = arith.constant 0 : index
    %159 = vector.load %arg13[%c0_61, %c0_62, %c0_63] : memref<2x32x128xf32, #tpu.memory_space<vmem>>, vector<2x32x128xf32>
    tpu.vector_store %arg13[%c0_61, %c0_62, %c0_63], %158 {strides = array<i32>} : memref<2x32x128xf32, #tpu.memory_space<vmem>>, vector<2x32x128xf32>,
    %c0_64 = arith.constant 0 : index
    %c0_65 = arith.constant 0 : index
    %160 = vector.load %arg12[%c0_64, %c0_65] : memref<1x128xf32, #tpu.memory_space<vmem>>, vector<1x128xf32>
    %161 = vector.shape_cast %160 : vector<1x128xf32> to vector<1x1x128xf32>
    %162 = vector.broadcast %161 : vector<1x1x128xf32> to vector<2x32x128xf32>
    %163 = arith.mulf %162, %153 : vector<2x32x128xf32>
    %164 = arith.addf %1, %163 : vector<2x32x128xf32>
    %c0_66 = arith.constant 0 : index
    %c0_67 = arith.constant 0 : index
    %c0_68 = arith.constant 0 : index
    %165 = vector.load %arg14[%c0_66, %c0_67, %c0_68] : memref<2x32x128xf32, #tpu.memory_space<vmem>>, vector<2x32x128xf32>
    tpu.vector_store %arg14[%c0_66, %c0_67, %c0_68], %164 {strides = array<i32>} : memref<2x32x128xf32, #tpu.memory_space<vmem>>, vector<2x32x128xf32>,
    return
  }
  func.func @transform_0(%arg0: i32) -> (i32, i32, i32) {
    %c0_i32 = arith.constant 0 : i32
    %c0_i32_0 = arith.constant 0 : i32
    %c0_i32_1 = arith.constant 0 : i32
    return %arg0, %c0_i32, %c0_i32_0 : i32, i32, i32
  }
  func.func @transform_1(%arg0: i32) -> (i32, i32, i32) {
    %c0_i32 = arith.constant 0 : i32
    %c0_i32_0 = arith.constant 0 : i32
    %c0_i32_1 = arith.constant 0 : i32
    return %arg0, %c0_i32, %c0_i32_0 : i32, i32, i32
  }
  func.func @transform_2(%arg0: i32) -> (i32, i32) {
    %c0_i32 = arith.constant 0 : i32
    %c0_i32_0 = arith.constant 0 : i32
    %c0_i32_1 = arith.constant 0 : i32
    return %c0_i32, %c0_i32_0 : i32, i32
  }
  func.func @transform_3(%arg0: i32) -> (i32, i32) {
    %c0_i32 = arith.constant 0 : i32
    %c0_i32_0 = arith.constant 0 : i32
    %c0_i32_1 = arith.constant 0 : i32
    return %c0_i32, %c0_i32_0 : i32, i32
  }
  func.func @transform_4(%arg0: i32) -> (i32, i32) {
    %c0_i32 = arith.constant 0 : i32
    %c0_i32_0 = arith.constant 0 : i32
    %c0_i32_1 = arith.constant 0 : i32
    return %c0_i32, %c0_i32_0 : i32, i32
  }
  func.func @transform_5(%arg0: i32) -> (i32, i32) {
    %c0_i32 = arith.constant 0 : i32
    %c0_i32_0 = arith.constant 0 : i32
    %c0_i32_1 = arith.constant 0 : i32
    return %c0_i32, %c0_i32_0 : i32, i32
  }
  func.func @transform_6(%arg0: i32) -> (i32, i32) {
    %c0_i32 = arith.constant 0 : i32
    %c0_i32_0 = arith.constant 0 : i32
    %c0_i32_1 = arith.constant 0 : i32
    return %c0_i32, %c0_i32_0 : i32, i32
  }
  func.func @transform_7(%arg0: i32) -> (i32, i32) {
    %c0_i32 = arith.constant 0 : i32
    %c0_i32_0 = arith.constant 0 : i32
    %c0_i32_1 = arith.constant 0 : i32
    return %c0_i32, %c0_i32_0 : i32, i32
  }
  func.func @transform_8(%arg0: i32) -> (i32, i32) {
    %c0_i32 = arith.constant 0 : i32
    %c0_i32_0 = arith.constant 0 : i32
    %c0_i32_1 = arith.constant 0 : i32
    return %c0_i32, %c0_i32_0 : i32, i32
  }
  func.func @transform_9(%arg0: i32) -> (i32, i32) {
    %c0_i32 = arith.constant 0 : i32
    %c0_i32_0 = arith.constant 0 : i32
    %c0_i32_1 = arith.constant 0 : i32
    return %c0_i32, %c0_i32_0 : i32, i32
  }
  func.func @transform_10(%arg0: i32) -> (i32, i32) {
    %c0_i32 = arith.constant 0 : i32
    %c0_i32_0 = arith.constant 0 : i32
    %c0_i32_1 = arith.constant 0 : i32
    return %c0_i32, %c0_i32_0 : i32, i32
  }
  func.func @transform_11(%arg0: i32) -> (i32, i32) {
    %c0_i32 = arith.constant 0 : i32
    %c0_i32_0 = arith.constant 0 : i32
    %c0_i32_1 = arith.constant 0 : i32
    return %c0_i32, %c0_i32_0 : i32, i32
  }
  func.func @transform_12(%arg0: i32) -> (i32, i32, i32) {
    %c0_i32 = arith.constant 0 : i32
    %c0_i32_0 = arith.constant 0 : i32
    %c0_i32_1 = arith.constant 0 : i32
    return %arg0, %c0_i32, %c0_i32_0 : i32, i32, i32
  }
  func.func @transform_13(%arg0: i32) -> (i32, i32, i32) {
    %c0_i32 = arith.constant 0 : i32
    %c0_i32_0 = arith.constant 0 : i32
    %c0_i32_1 = arith.constant 0 : i32
    return %arg0, %c0_i32, %c0_i32_0 : i32, i32, i32
  }
}

</mosaic_0001>

<bundles_post_ra>
// kernel: cross_modality_bi_attention_forward.1
= control target key start
LH: loop header
LB: loop body
LE: loop exit
PB: predicated region body
PF: predicated region fallthrough
CT: control target
= control target key end

     0   :  { %s5239_s0 = inlined_call_operand.vmem [shape: f32[4,32,128], index: 0, kind: input, shape index: {}]   ;;  %s5240_s1 = inlined_call_operand.vmem [shape: f32[4,32,128], index: 1, kind: input, shape index: {}]   ;;  %s5241_s2 = inlined_call_operand.vmem [shape: bf16[128,512], index: 2, kind: input, shape index: {}]   ;;  %s5242_s3 = inlined_call_operand.vmem [shape: f32[1,512], index: 3, kind: input, shape index: {}]   ;;  %s5243_s4 = inlined_call_operand.vmem [shape: bf16[128,512], index: 4, kind: input, shape index: {}]   ;;  %s5244_s5 = inlined_call_operand.vmem [shape: f32[1,512], index: 5, kind: input, shape index: {}]   ;;  %s5245_s6 = inlined_call_operand.vmem [shape: bf16[256,128], index: 6, kind: input, shape index: {}]   ;;  %s5246_s7 = inlined_call_operand.vmem [shape: f32[1,128], index: 7, kind: input, shape index: {}]   ;;  %s5247_s8 = inlined_call_operand.vmem [shape: bf16[256,128], index: 8, kind: input, shape index: {}]   ;;  %s5248_s9 = inlined_call_operand.vmem [shape: f32[1,128], index: 9, kind: input, shape index: {}]   ;;  %s5249_s10 = inlined_call_operand.vmem [shape: f32[1,128], index: 10, kind: input, shape index: {}]   ;;  %s5250_s11 = inlined_call_operand.vmem [shape: f32[1,128], index: 11, kind: input, shape index: {}]   ;;  %s5251_s12 = inlined_call_operand.hbm [shape: f32[4,32,128], index: 12, kind: output, shape index: {0}]   ;;  %s5252_s13 = inlined_call_operand.hbm [shape: f32[4,32,128], index: 13, kind: output, shape index: {1}]  }
   0x1   :  { %5258 = sst [smem:[#allocation12_spill]] %s5239_s0 }
   0x2   :  { %5259 = sst [smem:[#allocation13_spill]] %s5240_s1 }
   0x3   :  { %19 = vsyncpa [#allocation3], 0 }
   0x4   :  { %21 = vsyncpa [#allocation3 + $0x1], 0 }
   0x5   :  { %22 = vsyncpa [#allocation5], 0 }
   0x6   :  { %24 = vsyncpa [#allocation5 + $0x1], 0  ;;  %s4122_s25 = smov 0   ;;  %s4124_s26 = smov 0  }
   0x7   :  { %s4126_s27 = smov 0   ;;  %s4128_s28 = smov 0  }
   0x8 LB: > { %5260 = sst [smem:[#allocation8_spill]] %s4041_s27  ;;  %s4143_s29 = sadd.s32 4294967295, %s4045_s28   ;;  %s4045_s28 = sphi %s4128_s28, %s5270_s28   ;;  %s4041_s27 = sphi %s4126_s27, %s5272_s27   ;;  %s4037_s26 = sphi %s4124_s26, %s5274_s26   ;;  %s4033_s25 = sphi %s4122_s25, %s5273_s25  }
   0x9   : > { %s3208_s30 = sadd.s32 4294967294, %s4045_s28   ;;  %s4147_s14 = sadd.s32 1, %s4045_s28  }
   0xa   : > { %5261 = sst [smem:[#allocation9_spill]] %s4147_s14  ;;  %s299_s15 = sadd.s32 1, %s4041_s27 }
   0xb   : > { %s296_s16 = ssub.s32 %s4045_s28, %s4147_s14  ;;  %p309_p0 = scmp.ne.s32.totalorder %s4041_s27, %s4037_s26 }
   0xc   : > { %p297_p1 = scmp.eq.s32.totalorder %s296_s16, 0  ;;  %p310_p2 = scmp.eq.s32.totalorder %s4143_s29, 1 }
   0xd   : > { %p315_p3 = scmp.ne.s32.totalorder %s4037_s26, %s4033_s25  ;;  %p316_p4 = scmp.eq.s32.totalorder %s3208_s30, 1 }
   0xe   : > { %s4158_s17 = scalar_select %p297_p1, %s4041_s27, %s299_s15  }
   0xf   : > { %p4160_p5 = por %p310_p2, %p309_p0  ;;  %p4164_p6 = por %p316_p4, %p315_p3 }
  0x10   : > { %5262 = sst [smem:[#allocation10_spill]] %s4158_s17  ;;  %p3211_p7 = scmp.ge.s32.totalorder %s4045_s28, 1 }
  0x11   : > { %s5264_s19 = scalar_select %p4164_p6, 1, 0 }
  0x12   : > { %p410_p8 = scmp.lt.s32.totalorder %s4045_s28, 3 }
  0x13   : > { %5265 = sst [smem:[#allocation11_spill]] %s5264_s19 }
  0x14   : > { %p411_p9 = pnand %p3211_p7, %p410_p8 }
  0x15   : > { %s3214_s20 = sshll.u32 (!%p411_p9), %s4143_s29, 1  ;;  %s5266_s0 = sld [smem:[#allocation12_spill]] (!%p411_p9)  ;;  %v3703_v16 = vld [vmem:[%s5241_s2 + $0x4] ss:$16 sps:$4 sm:$0xff] (!%p411_p9)   ;;  %v3705_v17 = vld [vmem:[%s5241_s2 + $0xc] ss:$16 sps:$4 sm:$0xff] (!%p411_p9)  }
  0x16   : > { %414 = sbr.rel (%p411_p9) target bundleno = 2277 (0x8e5), region = 68  ;;  %p467_p10 = scmp.lt.s32.totalorder (!%p411_p9), %s3214_s20, 3  ;;  %v3707_v18 = vld [vmem:[%s5241_s2] ss:$16 sps:$4 sm:$0xff] (!%p411_p9)   ;;  %v3708_v19 = vld [vmem:[%s5241_s2 + $0x8] ss:$16 sps:$4 sm:$0xff] (!%p411_p9)   ;;  %898 = vmatprep.subr.bf16.mxu0 (!%p411_p9), %v3703_v16  ;;  %971 = vmatprep.subr.bf16.mxu1 (!%p411_p9), %v3705_v17 }
  0x17   : > { %s5267_s1 = sld [smem:[#allocation13_spill]] (!%p411_p9)  ;;  %v3709_v20 = vld [vmem:[%s5241_s2 + $0x24] ss:$16 sps:$4 sm:$0xff] (!%p411_p9)   ;;  %v3711_v21 = vld [vmem:[%s5241_s2 + $0x2c] ss:$16 sps:$4 sm:$0xff] (!%p411_p9)   ;;  %899 = vmatpush1.bf16.msra.mxu0 (!%p411_p9), %v3707_v18  ;;  %972 = vmatpush1.bf16.msra.mxu1 (!%p411_p9), %v3708_v19  ;;  %vm1518_vm0 = vcmask (!%p411_p9), 261120  }
  0x18   : > { %v3713_v22 = vld [vmem:[%s5241_s2 + $0x20] ss:$16 sps:$4 sm:$0xff] (!%p411_p9)   ;;  %v3714_v23 = vld [vmem:[%s5241_s2 + $0x28] ss:$16 sps:$4 sm:$0xff] (!%p411_p9)   ;;  %900 = vmatprep.subr.bf16.mxu0 (!%p411_p9), %v3709_v20  ;;  %973 = vmatprep.subr.bf16.mxu1 (!%p411_p9), %v3711_v21  ;;  %v3715_v24 = vld [vmem:[%s5241_s2 + $0x44] ss:$16 sps:$4 sm:$0xff] (!%p411_p9)  }
  0x19   : > { %v3717_v25 = vld [vmem:[%s5241_s2 + $0x4c] ss:$16 sps:$4 sm:$0xff] (!%p411_p9)   ;;  %v3725_v20 = vld [vmem:[%s5241_s2 + $0x60] ss:$16 sps:$4 sm:$0xff] (!%p411_p9)   ;;  %s5257_s23 = sshll.u32 (!%p411_p9), %s4143_s29, 10 }
  0x1a   : > { %s5124_s17 = scalar_lea.hbm (!%p411_p9), %s5251_s12, %s5257_s23 }
  0x1b   : > { %901 = vmatpush1.bf16.msra.mxu0 (!%p411_p9), %v3713_v22  ;;  %974 = vmatpush1.bf16.msra.mxu1 (!%p411_p9), %v3714_v23 }
  0x1c   : > { %902 = vmatprep.subr.bf16.mxu0 (!%p411_p9), %v3715_v24  ;;  %975 = vmatprep.subr.bf16.mxu1 (!%p411_p9), %v3717_v25 }
  0x1d   : > { %s5276_s20 = smov (!%p467_p10, %s3214_s20), 3 }
  0x1e   : > { %s3346_s21 = sshll.u32 %s5276_s20, 5  ;;  %s4048_s20 = smov [#allocation2]  }
  0x1f   : > { %s4174_s24 = scalar_lea.vmem %s5266_s0, %s3346_s21  ;;  %s4197_s16 = scalar_lea.vmem %s5267_s1, %s3346_s21 }
  0x20   : > { %v483_v0 = vld [vmem:[%s4174_s24] sm:$0xff]  ;;  %v485_v1 = vld [vmem:[%s4174_s24 + $0x10] sm:$0xff]  ;;  %v484_v2 = vld [vmem:[%s4174_s24 + $0x8] sm:$0xff]  ;;  %s5072_s0 = sand.u32 1, %s4037_s26   ;;  %s3955_s21 = sshll.u32 %s4048_s20, 4  ;;  %s3956_s21 = int_to_ptr.vmem [resolvable:$false] %s3955_s21 }
  0x21   : > { %499 = vadd.xlane.f32.xlu0 %v483_v0  ;;  %503 = vadd.xlane.f32.xlu1 %v485_v1  ;;  %v486_v3 = vld [vmem:[%s4174_s24 + $0x18] sm:$0xff]  ;;  %v4181_v4 = vld [vmem:[%s4174_s24 + $0x20] sm:$0xff]  ;;  %v4184_v5 = vld [vmem:[%s4174_s24 + $0x28] sm:$0xff]  ;;  %s3212_s19 = sshll.u32 %s5072_s0, 6  ;;  %s3957_s22 = scalar_lea.vmem %s3956_s21, 2048 }
  0x22   : > { %v4187_v6 = vld [vmem:[%s4174_s24 + $0x30] sm:$0xff]  ;;  %v4190_v7 = vld [vmem:[%s4174_s24 + $0x38] sm:$0xff]  ;;  %v4200_v8 = vld [vmem:[%s4197_s16] sm:$0xff]  ;;  %s5085_s30 = scalar_lea.vmem [#allocation2], %s3212_s19  ;;  %s5131_s15 = scalar_lea.vmem [#allocation4], %s3212_s19 }
  0x23   : > { %v4203_v9 = vld [vmem:[%s4197_s16 + $0x8] sm:$0xff]  ;;  %v4208_v10 = vld [vmem:[%s4197_s16 + $0x10] sm:$0xff]  ;;  %v4211_v11 = vld [vmem:[%s4197_s16 + $0x18] sm:$0xff]  ;;  %s3085_s1 = sshll.u32 %s5085_s30, 4  ;;  %s5126_s1 = int_to_ptr.vmem [resolvable:$true] %s3085_s1 }
  0x24   : > { %v4216_v12 = vld [vmem:[%s4197_s16 + $0x20] sm:$0xff]  ;;  %v4219_v13 = vld [vmem:[%s4197_s16 + $0x28] sm:$0xff]  ;;  %v4224_v14 = vld [vmem:[%s4197_s16 + $0x30] sm:$0xff]  ;;  %s3951_s19 = scalar_lea.vmem %s5126_s1, 1024  ;;  %p3958_p0 = scmp.lt.s32.totalorder %s5126_s1, %s3956_s21 }
  0x25   : > { %501 = vadd.xlane.f32.xlu0 %v484_v2  ;;  %505 = vadd.xlane.f32.xlu1 %v486_v3  ;;  %v4227_v15 = vld [vmem:[%s4197_s16 + $0x38] sm:$0xff]  ;;  %p3952_p11 = scmp.ne.s32.totalorder %s5126_s1, %s3951_s19  ;;  %p3959_p1 = scmp.lt.s32.totalorder %s3957_s22, %s3951_s19 }
  0x27   : > { %p3953_p12 = pnand %p3952_p11, %p4160_p5  ;;  %p3960_p2 = por %p3959_p1, %p3958_p0 }
  0x29   : > { %507 = vadd.xlane.f32.xlu0 %v4181_v4  ;;  %509 = vadd.xlane.f32.xlu1 %v4184_v5  ;;  %p3954_p13 = pneg %p3953_p12 }
  0x2b   : > { %p3961_p3 = pnand %p3960_p2, %p3954_p13 }
  0x2d   : > { %511 = vadd.xlane.f32.xlu0 %v4187_v6  ;;  %513 = vadd.xlane.f32.xlu1 %v4190_v7 }
  0x31   : > { %592 = vadd.xlane.f32.xlu0 %v4200_v8  ;;  %594 = vadd.xlane.f32.xlu1 %v4203_v9 }
  0x35   : > { %596 = vadd.xlane.f32.xlu0 %v4208_v10  ;;  %598 = vadd.xlane.f32.xlu1 %v4211_v11 }
  0x39   : > { %600 = vadd.xlane.f32.xlu0 %v4216_v12  ;;  %602 = vadd.xlane.f32.xlu1 %v4219_v13 }
  0x3d   : > { %604 = vadd.xlane.f32.xlu0 %v4224_v14  ;;  %606 = vadd.xlane.f32.xlu1 %v4227_v15 }
  0xae   : > { %v500_v26 = vpop.xlane.xlu0 %499  ;;  %v504_v27 = vpop.xlane.xlu1 %503 }
  0xaf   : > { %v516_v28 = vmul.f32 0.0078125, %v500_v26  ;;  %v518_v29 = vmul.f32 0.0078125, %v504_v27  ;;  %v3727_v26 = vld [vmem:[%s5241_s2 + $0x84] ss:$16 sps:$4 sm:$0xff]   ;;  %v3729_v27 = vld [vmem:[%s5241_s2 + $0x8c] ss:$16 sps:$4 sm:$0xff]  }
  0xb1   : > { %v4263_v30 = vsub.f32 %v483_v0, %v516_v28  ;;  %v4265_v31 = vsub.f32 %v485_v1, %v518_v29  ;;  %v3719_v0 = vld [vmem:[%s5241_s2 + $0x40] ss:$16 sps:$4 sm:$0xff]   ;;  %v3720_v1 = vld [vmem:[%s5241_s2 + $0x48] ss:$16 sps:$4 sm:$0xff]  }
  0xb2   : > { %v502_v32 = vpop.xlane.xlu0 %501  ;;  %v506_v33 = vpop.xlane.xlu1 %505  ;;  %903 = vmatpush1.bf16.msra.mxu0 %v3719_v0  ;;  %976 = vmatpush1.bf16.msra.mxu1 %v3720_v1 }
  0xb3   : > { %v517_v34 = vmul.f32 0.0078125, %v502_v32  ;;  %v532_v35 = vmul.f32 %v4263_v30, %v4263_v30  ;;  %v519_v36 = vmul.f32 0.0078125, %v506_v33  ;;  %v534_v39 = vmul.f32 %v4265_v31, %v4265_v31 }
  0xb5   : > { %v4269_v37 = vsub.f32 %v484_v2, %v517_v34  ;;  %540 = vadd.xlane.f32.xlu0 %v532_v35  ;;  %v4271_v38 = vsub.f32 %v486_v3, %v519_v36 }
  0xb6   : > { %v508_v40 = vpop.xlane.xlu0 %507  ;;  %v510_v41 = vpop.xlane.xlu1 %509 }
  0xb7   : > { %v520_v42 = vmul.f32 0.0078125, %v508_v40  ;;  %v533_v43 = vmul.f32 %v4269_v37, %v4269_v37  ;;  %v521_v44 = vmul.f32 0.0078125, %v510_v41  ;;  %v535_v47 = vmul.f32 %v4271_v38, %v4271_v38  ;;  %v3733_v40 = vld [vmem:[%s5241_s2 + $0xa4] ss:$16 sps:$4 sm:$0xff]   ;;  %v3735_v41 = vld [vmem:[%s5241_s2 + $0xac] ss:$16 sps:$4 sm:$0xff]  }
  0xb9   : > { %v4278_v45 = vsub.f32 %v4181_v4, %v520_v42  ;;  %544 = vadd.xlane.f32.xlu0 %v534_v39  ;;  %542 = vadd.xlane.f32.xlu1 %v533_v43  ;;  %v4281_v46 = vsub.f32 %v4184_v5, %v521_v44  ;;  %v3739_v44 = vld [vmem:[%s5241_s2 + $0xc4] ss:$16 sps:$4 sm:$0xff]  }
  0xba   : > { %v512_v48 = vpop.xlane.xlu0 %511  ;;  %v514_v49 = vpop.xlane.xlu1 %513 }
  0xbb   : > { %v522_v50 = vmul.f32 0.0078125, %v512_v48  ;;  %v536_v51 = vmul.f32 %v4278_v45, %v4278_v45  ;;  %v523_v52 = vmul.f32 0.0078125, %v514_v49  ;;  %v537_v55 = vmul.f32 %v4281_v46, %v4281_v46  ;;  %v3743_v48 = vld [vmem:[%s5241_s2 + $0xc0] ss:$16 sps:$4 sm:$0xff]   ;;  %v3744_v49 = vld [vmem:[%s5241_s2 + $0xc8] ss:$16 sps:$4 sm:$0xff]  }
  0xbd   : > { %v4288_v53 = vsub.f32 %v4187_v6, %v522_v50  ;;  %546 = vadd.xlane.f32.xlu1 %v535_v47  ;;  %548 = vadd.xlane.f32.xlu0 %v536_v51  ;;  %v4291_v54 = vsub.f32 %v4190_v7, %v523_v52  ;;  %v3721_v7 = vld [vmem:[%s5241_s2 + $0x64] ss:$16 sps:$4 sm:$0xff]   ;;  %v3741_v47 = vld [vmem:[%s5241_s2 + $0xcc] ss:$16 sps:$4 sm:$0xff]   ;;  %v3749_v52 = vld [vmem:[%s5241_s2 + $0xe0] ss:$16 sps:$4 sm:$0xff]  }
  0xbe   : > { %v593_v56 = vpop.xlane.xlu0 %592  ;;  %v595_v57 = vpop.xlane.xlu1 %594  ;;  %904 = vmatprep.subr.bf16.mxu0 %v3721_v7  ;;  %v3745_v50 = vld [vmem:[%s5241_s2 + $0xe4] ss:$16 sps:$4 sm:$0xff]   ;;  %v3747_v51 = vld [vmem:[%s5241_s2 + $0xec] ss:$16 sps:$4 sm:$0xff]  }
  0xbf   : > { %v608_v58 = vmul.f32 0.0078125, %v593_v56  ;;  %v538_v59 = vmul.f32 %v4288_v53, %v4288_v53  ;;  %v609_v60 = vmul.f32 0.0078125, %v595_v57  ;;  %v539_v63 = vmul.f32 %v4291_v54, %v4291_v54  ;;  %905 = vmatpush1.bf16.msra.mxu0 %v3725_v20  ;;  %v3753_v56 = vld [vmem:[%s5243_s4 + $0x4] ss:$16 sps:$4 sm:$0xff]   ;;  %v3756_v57 = vld [vmem:[%s5243_s4 + $0xc] ss:$16 sps:$4 sm:$0xff]  }
  0xc0   : > { %906 = vmatprep.subr.bf16.mxu0 %v3727_v26 }
  0xc1   : > { %v4298_v61 = vsub.f32 %v4200_v8, %v608_v58  ;;  %550 = vadd.xlane.f32.xlu1 %v537_v55  ;;  %552 = vadd.xlane.f32.xlu0 %v538_v59  ;;  %v4301_v62 = vsub.f32 %v4203_v9, %v609_v60  ;;  %v3723_v8 = vld [vmem:[%s5241_s2 + $0x6c] ss:$16 sps:$4 sm:$0xff]   ;;  %v3750_v55 = vld [vmem:[%s5241_s2 + $0xe8] ss:$16 sps:$4 sm:$0xff]   ;;  %v4047_v58 = vmov 0  }
  0xc2   : > { %v597_v2 = vpop.xlane.xlu0 %596  ;;  %v599_v3 = vpop.xlane.xlu1 %598  ;;  %977 = vmatprep.subr.bf16.mxu1 %v3723_v8  ;;  %930 = vmatprep.mubr.bf16.mxu0 %v4047_v58 }
  0xc3   : > { %v610_v4 = vmul.f32 0.0078125, %v597_v2  ;;  %v624_v5 = vmul.f32 %v4298_v61, %v4298_v61  ;;  %v611_v6 = vmul.f32 0.0078125, %v599_v3  ;;  %v625_v17 = vmul.f32 %v4301_v62, %v4301_v62  ;;  %1003 = vmatprep.mubr.bf16.mxu1 %v4047_v58 }
  0xc5   : > { %v4320_v9 = vsub.f32 %v4208_v10, %v610_v4  ;;  %554 = vadd.xlane.f32.xlu1 %v539_v63  ;;  %632 = vadd.xlane.f32.xlu0 %v624_v5  ;;  %v4323_v16 = vsub.f32 %v4211_v11, %v611_v6  ;;  %v3726_v10 = vld [vmem:[%s5241_s2 + $0x68] ss:$16 sps:$4 sm:$0xff]  }
  0xc6   : > { %v601_v18 = vpop.xlane.xlu0 %600  ;;  %v603_v19 = vpop.xlane.xlu1 %602  ;;  %978 = vmatpush1.bf16.msra.mxu1 %v3726_v10 }
  0xc7   : > { %v612_v21 = vmul.f32 0.0078125, %v601_v18  ;;  %v626_v11 = vmul.f32 %v4320_v9, %v4320_v9  ;;  %v613_v22 = vmul.f32 0.0078125, %v603_v19  ;;  %v627_v25 = vmul.f32 %v4323_v16, %v4323_v16  ;;  %979 = vmatprep.subr.bf16.mxu1 %v3729_v27 }
  0xc9   : > { %v4336_v23 = vsub.f32 %v4216_v12, %v612_v21  ;;  %634 = vadd.xlane.f32.xlu1 %v625_v17  ;;  %636 = vadd.xlane.f32.xlu0 %v626_v11  ;;  %v4339_v24 = vsub.f32 %v4219_v13, %v613_v22  ;;  %v3731_v12 = vld [vmem:[%s5241_s2 + $0x80] ss:$16 sps:$4 sm:$0xff]   ;;  %v3732_v13 = vld [vmem:[%s5241_s2 + $0x88] ss:$16 sps:$4 sm:$0xff]  }
  0xca   : > { %v605_v28 = vpop.xlane.xlu0 %604  ;;  %v607_v29 = vpop.xlane.xlu1 %606  ;;  %907 = vmatpush1.bf16.msra.mxu0 %v3731_v12  ;;  %980 = vmatpush1.bf16.msra.mxu1 %v3732_v13  ;;  %v3751_v12 = vld [vmem:[%s5243_s4] ss:$16 sps:$4 sm:$0xff]   ;;  %v3754_v13 = vld [vmem:[%s5243_s4 + $0x8] ss:$16 sps:$4 sm:$0xff]  }
  0xcb   : > { %v614_v32 = vmul.f32 0.0078125, %v605_v28  ;;  %v628_v33 = vmul.f32 %v4336_v23, %v4336_v23  ;;  %v615_v34 = vmul.f32 0.0078125, %v607_v29  ;;  %v629_v39 = vmul.f32 %v4339_v24, %v4339_v24  ;;  %908 = vmatprep.subr.bf16.mxu0 %v3733_v40  ;;  %981 = vmatprep.subr.bf16.mxu1 %v3735_v41  ;;  %v3757_v41 = vld [vmem:[%s5243_s4 + $0x20] ss:$16 sps:$4 sm:$0xff]  }
  0xcd   : > { %v4358_v35 = vsub.f32 %v4224_v14, %v614_v32  ;;  %638 = vadd.xlane.f32.xlu1 %v627_v25  ;;  %640 = vadd.xlane.f32.xlu0 %v628_v33  ;;  %v4361_v36 = vsub.f32 %v4227_v15, %v615_v34  ;;  %v3737_v14 = vld [vmem:[%s5241_s2 + $0xa0] ss:$16 sps:$4 sm:$0xff]   ;;  %v3738_v15 = vld [vmem:[%s5241_s2 + $0xa8] ss:$16 sps:$4 sm:$0xff]   ;;  %v3759_v33 = vld [vmem:[%s5243_s4 + $0x24] ss:$16 sps:$4 sm:$0xff]  }
  0xce   : > { %909 = vmatpush1.bf16.msra.mxu0 %v3737_v14  ;;  %982 = vmatpush1.bf16.msra.mxu1 %v3738_v15  ;;  %v3760_v14 = vld [vmem:[%s5243_s4 + $0x28] ss:$16 sps:$4 sm:$0xff]  }
  0xcf   : > { %v630_v42 = vmul.f32 %v4358_v35, %v4358_v35  ;;  %v631_v43 = vmul.f32 %v4361_v36, %v4361_v36  ;;  %910 = vmatprep.subr.bf16.mxu0 %v3739_v44  ;;  %983 = vmatprep.subr.bf16.mxu1 %v3741_v47  ;;  %v3768_v44 = vld [vmem:[%s5243_s4 + $0x4c] ss:$16 sps:$4 sm:$0xff]  }
  0xd1   : > { %642 = vadd.xlane.f32.xlu1 %v629_v39  ;;  %644 = vadd.xlane.f32.xlu0 %v630_v42 }
  0xd2   : > { %911 = vmatpush1.bf16.msra.mxu0 %v3743_v48  ;;  %984 = vmatpush1.bf16.msra.mxu1 %v3744_v49 }
  0xd3   : > { %912 = vmatprep.subr.bf16.mxu0 %v3745_v50  ;;  %985 = vmatprep.subr.bf16.mxu1 %v3747_v51  ;;  %v3766_v51 = vld [vmem:[%s5243_s4 + $0x48] ss:$16 sps:$4 sm:$0xff]  }
  0xd5   : > { %646 = vadd.xlane.f32.xlu1 %v631_v43  ;;  %v3765_v43 = vld [vmem:[%s5243_s4 + $0x44] ss:$16 sps:$4 sm:$0xff]  }
  0xd6   : > { %913 = vmatpush1.bf16.msra.mxu0 %v3749_v52  ;;  %986 = vmatpush1.bf16.msra.mxu1 %v3750_v55  ;;  %v3771_v55 = vld [vmem:[%s5243_s4 + $0x64] ss:$16 sps:$4 sm:$0xff]  }
  0xd7   : > { %1258 = vmatprep.subr.bf16.mxu0 %v3753_v56  ;;  %1331 = vmatprep.subr.bf16.mxu1 %v3756_v57 }
 0x142   : > { %v541_v59 = vpop.xlane.xlu0 %540 }
 0x143   : > { %v556_v60 = vmul.f32 0.0078125, %v541_v59 }
 0x145   : > { %v564_v63 = vadd.f32 1e-06, %v556_v60 }
 0x146   : > { %v543_v0 = vpop.xlane.xlu1 %542  ;;  %v545_v1 = vpop.xlane.xlu0 %544 }
 0x147   : > { %v557_v2 = vmul.f32 0.0078125, %v543_v0  ;;  %3831 = vrsqrt.f32 %v564_v63  ;;  %v558_v4 = vmul.f32 0.0078125, %v545_v1  ;;  %v3769_v63 = vld [vmem:[%s5243_s4 + $0x60] ss:$16 sps:$4 sm:$0xff]   ;;  %v3772_v0 = vld [vmem:[%s5243_s4 + $0x68] ss:$16 sps:$4 sm:$0xff]  }
 0x149   : > { %v565_v3 = vadd.f32 1e-06, %v557_v2  ;;  %v566_v7 = vadd.f32 1e-06, %v558_v4  ;;  %v3780_v4 = vld [vmem:[%s5243_s4 + $0x8c] ss:$16 sps:$4 sm:$0xff]  }
 0x14a   : > { %v547_v5 = vpop.xlane.xlu1 %546  ;;  %v549_v17 = vpop.xlane.xlu0 %548 }
 0x14b   : > { %3833 = vrsqrt.f32 %v565_v3  ;;  %v559_v6 = vmul.f32 0.0078125, %v547_v5  ;;  %v560_v20 = vmul.f32 0.0078125, %v549_v17  ;;  %v3777_v3 = vld [vmem:[%s5243_s4 + $0x84] ss:$16 sps:$4 sm:$0xff]   ;;  %v3778_v17 = vld [vmem:[%s5243_s4 + $0x88] ss:$16 sps:$4 sm:$0xff]  }
 0x14d   : > { %v567_v8 = vadd.f32 1e-06, %v559_v6  ;;  %v568_v25 = vadd.f32 1e-06, %v560_v20 }
 0x14e   : > { %v551_v18 = vpop.xlane.xlu1 %550  ;;  %v553_v26 = vpop.xlane.xlu0 %552 }
 0x14f   : > { %3835 = vrsqrt.f32 %v567_v8  ;;  %v561_v19 = vmul.f32 0.0078125, %v551_v18  ;;  %v562_v34 = vmul.f32 0.0078125, %v553_v26 }
 0x150   : > { %3837 = vrsqrt.f32 %v566_v7 }
 0x151   : > { %v3832_v10 = vpop.eup %3831  ;;  %v569_v21 = vadd.f32 1e-06, %v561_v19  ;;  %v570_v47 = vadd.f32 1e-06, %v562_v34  ;;  %v3783_v19 = vld [vmem:[%s5243_s4 + $0xa4] ss:$16 sps:$4 sm:$0xff]  }
 0x152   : > { %v555_v11 = vpop.xlane.xlu1 %554  ;;  %v580_v27 = vmul.f32 %v3832_v10, %v4263_v30  ;;  %v3762_v30 = vld [vmem:[%s5243_s4 + $0x2c] ss:$16 sps:$4 sm:$0xff]   ;;  %v633_v48 = vpop.xlane.xlu0 %632  ;;  %v3795_v34 = vld [vmem:[%s5243_s4 + $0xe4] ss:$16 sps:$4 sm:$0xff]  }
 0x153   : > { %3839 = vrsqrt.f32 %v569_v21  ;;  %v563_v29 = vmul.f32 0.0078125, %v555_v11  ;;  %v648_v57 = vmul.f32 0.0078125, %v633_v48 }
 0x154   : > { %3841 = vrsqrt.f32 %v568_v25  ;;  %v3784_v25 = vld [vmem:[%s5243_s4 + $0xa8] ss:$16 sps:$4 sm:$0xff]  }
 0x155   : > { %v3834_v22 = vpop.eup %3833  ;;  %v571_v40 = vadd.f32 1e-06, %v563_v29  ;;  %v656_v5 = vadd.f32 1e-06, %v648_v57  ;;  %v3792_v29 = vld [vmem:[%s5243_s4 + $0xcc] ss:$16 sps:$4 sm:$0xff]  }
 0x156   : > { %v581_v28 = vmul.f32 %v3834_v22, %v4269_v37  ;;  %v635_v15 = vpop.xlane.xlu1 %634  ;;  %v637_v6 = vpop.xlane.xlu0 %636  ;;  %v3781_v22 = vld [vmem:[%s5243_s4 + $0xa0] ss:$16 sps:$4 sm:$0xff]  }
 0x157   : > { %3843 = vrsqrt.f32 %v571_v40  ;;  %v649_v50 = vmul.f32 0.0078125, %v635_v15  ;;  %v650_v10 = vmul.f32 0.0078125, %v637_v6  ;;  %v3793_v15 = vld [vmem:[%s5243_s4 + $0xe0] ss:$16 sps:$4 sm:$0xff]  }
 0x158   : > { %v588_v32 = vpack.c.bf16 %v581_v28, %v580_v27  ;;  %3845 = vrsqrt.f32 %v570_v47  ;;  %v3789_v28 = vld [vmem:[%s5243_s4 + $0xc4] ss:$16 sps:$4 sm:$0xff]  }
 0x159   : > { %v3836_v37 = vpop.eup %3835  ;;  %v657_v60 = vadd.f32 1e-06, %v649_v50 }
 0x15a   : > { %931 = vmatmul.mubr.bf16.vlgmr.msra.gmra.mrb[0].mxu0 %v588_v32  ;;  %1004 = vmatmul.mubr.bf16.vlgmr.msra.gmra.mrb[0].mxu1 %v588_v32  ;;  %v3838_v39 = vpop.eup %3837  ;;  %v583_v42 = vmul.f32 %v3836_v37, %v4271_v38  ;;  %v3763_v38 = vld [vmem:[%s5243_s4 + $0x40] ss:$16 sps:$4 sm:$0xff]   ;;  %v639_v1 = vpop.xlane.xlu1 %638 }
 0x15b   : > { %1259 = vmatpush1.bf16.msra.mxu0 %v3751_v12  ;;  %1332 = vmatpush1.bf16.msra.mxu1 %v3754_v13  ;;  %v582_v49 = vmul.f32 %v3838_v39, %v4265_v31  ;;  %v3774_v31 = vld [vmem:[%s5243_s4 + $0x6c] ss:$16 sps:$4 sm:$0xff]   ;;  %3847 = vrsqrt.f32 %v657_v60  ;;  %v651_v8 = vmul.f32 0.0078125, %v639_v1  ;;  %v658_v12 = vadd.f32 1e-06, %v650_v10  ;;  %v641_v13 = vpop.xlane.xlu0 %640 }
 0x15c   : > { %1260 = vmatprep.subr.bf16.mxu0 %v3759_v33  ;;  %1333 = vmatprep.subr.bf16.mxu1 %v3762_v30  ;;  %3849 = vrsqrt.f32 %v656_v5  ;;  %v3790_v30 = vld [vmem:[%s5243_s4 + $0xc8] ss:$16 sps:$4 sm:$0xff]   ;;  %v652_v40 = vmul.f32 0.0078125, %v641_v13  ;;  %v718_v5 = vlaneseq }
 0x15d   : > { %940 = vmatprep.mubr.bf16.mxu0 %v4047_v58  ;;  %1013 = vmatprep.mubr.bf16.mxu1 %v4047_v58  ;;  %v589_v52 = vpack.c.bf16 %v583_v42, %v582_v49  ;;  %v3840_v56 = vpop.eup %3839  ;;  %v659_v11 = vadd.f32 1e-06, %v651_v8  ;;  %v3796_v42 = vld [vmem:[%s5243_s4 + $0xe8] ss:$16 sps:$4 sm:$0xff]  }
 0x15e   : > { %v3842_v59 = vpop.eup %3841  ;;  %v585_v2 = vmul.f32 %v3840_v56, %v4281_v46  ;;  %v3775_v46 = vld [vmem:[%s5243_s4 + $0x80] ss:$16 sps:$4 sm:$0xff]   ;;  %v643_v26 = vpop.xlane.xlu1 %642  ;;  %v660_v47 = vadd.f32 1e-06, %v652_v40 }
 0x15f   : > { %1261 = vmatpush1.bf16.msra.mxu0 %v3757_v41  ;;  %1334 = vmatpush1.bf16.msra.mxu1 %v3760_v14  ;;  %v584_v7 = vmul.f32 %v3842_v59, %v4278_v45  ;;  %v3786_v45 = vld [vmem:[%s5243_s4 + $0xac] ss:$16 sps:$4 sm:$0xff]   ;;  %3851 = vrsqrt.f32 %v659_v11  ;;  %v653_v33 = vmul.f32 0.0078125, %v643_v26  ;;  %v645_v49 = vpop.xlane.xlu0 %644 }
 0x160   : > { %1262 = vmatprep.subr.bf16.mxu0 %v3765_v43  ;;  %1335 = vmatprep.subr.bf16.mxu1 %v3768_v44  ;;  %3853 = vrsqrt.f32 %v658_v12 }
 0x161   : > { %v590_v18 = vpack.c.bf16 %v585_v2, %v584_v7  ;;  %v3844_v20 = vpop.eup %3843  ;;  %v661_v14 = vadd.f32 1e-06, %v653_v33  ;;  %v716_v7 = vld [vmem:[%s5242_s3] sm:$0xf] }
 0x162   : > { %941 = vmatmul.mubr.bf16.gmra.mrb[4].mxu0 %v589_v52  ;;  %1014 = vmatmul.mubr.bf16.gmra.mrb[4].mxu1 %v589_v52  ;;  %v3846_v21 = vpop.eup %3845  ;;  %v587_v27 = vmul.f32 %v3844_v20, %v4291_v54  ;;  %v3787_v54 = vld [vmem:[%s5243_s4 + $0xc0] ss:$16 sps:$4 sm:$0xff]   ;;  %v647_v44 = vpop.xlane.xlu1 %646  ;;  %v654_v52 = vmul.f32 0.0078125, %v645_v49 }
 0x163   : > { %1263 = vmatpush1.bf16.msra.mxu0 %v3763_v38  ;;  %1336 = vmatpush1.bf16.msra.mxu1 %v3766_v51  ;;  %v586_v32 = vmul.f32 %v3846_v21, %v4288_v53  ;;  %v3798_v53 = vld [vmem:[%s5243_s4 + $0xec] ss:$16 sps:$4 sm:$0xff]   ;;  %3855 = vrsqrt.f32 %v661_v14  ;;  %v655_v50 = vmul.f32 0.0078125, %v647_v44 }
 0x164   : > { %1264 = vmatprep.subr.bf16.mxu0 %v3771_v55  ;;  %1337 = vmatprep.subr.bf16.mxu1 %v3774_v31  ;;  %3857 = vrsqrt.f32 %v660_v47 }
 0x165   : > { %950 = vmatprep.mubr.bf16.mxu0 %v4047_v58  ;;  %1023 = vmatprep.mubr.bf16.mxu1 %v4047_v58  ;;  %v591_v37 = vpack.c.bf16 %v587_v27, %v586_v32  ;;  %v3848_v39 = vpop.eup %3847  ;;  %v663_v55 = vadd.f32 1e-06, %v655_v50 }
 0x166   : > { %v3850_v41 = vpop.eup %3849  ;;  %v673_v43 = vmul.f32 %v3848_v39, %v4301_v62 }
 0x167   : > { %1265 = vmatpush1.bf16.msra.mxu0 %v3769_v63  ;;  %1338 = vmatpush1.bf16.msra.mxu1 %v3772_v0  ;;  %v672_v48 = vmul.f32 %v3850_v41, %v4298_v61  ;;  %v662_v61 = vadd.f32 1e-06, %v654_v52  ;;  %3859 = vrsqrt.f32 %v663_v55 }
 0x168   : > { %1266 = vmatprep.subr.bf16.mxu0 %v3777_v3  ;;  %1339 = vmatprep.subr.bf16.mxu1 %v3780_v4 }
 0x169   : > { %v680_v38 = vpack.c.bf16 %v673_v43, %v672_v48  ;;  %v3852_v51 = vpop.eup %3851  ;;  %3861 = vrsqrt.f32 %v662_v61 }
 0x16a   : > { %951 = vmatmul.mubr.bf16.gmra.mrb[8].mxu0 %v590_v18  ;;  %1024 = vmatmul.mubr.bf16.gmra.mrb[8].mxu1 %v590_v18  ;;  %v3854_v62 = vpop.eup %3853  ;;  %v675_v31 = vmul.f32 %v3852_v51, %v4323_v16 }
 0x16b   : > { %1267 = vmatpush1.bf16.msra.mxu0 %v3775_v46  ;;  %1340 = vmatpush1.bf16.msra.mxu1 %v3778_v17  ;;  %v674_v56 = vmul.f32 %v3854_v62, %v4320_v9 }
 0x16c   : > { %1268 = vmatprep.subr.bf16.mxu0 %v3783_v19  ;;  %1341 = vmatprep.subr.bf16.mxu1 %v3786_v45 }
 0x16d   : > { %960 = vmatprep.mubr.bf16.mxu0 %v4047_v58  ;;  %1033 = vmatprep.mubr.bf16.mxu1 %v4047_v58  ;;  %v681_v57 = vpack.c.bf16 %v675_v31, %v674_v56  ;;  %v3856_v59 = vpop.eup %3855 }
 0x16e   : > { %v3858_v60 = vpop.eup %3857  ;;  %v677_v63 = vmul.f32 %v3856_v59, %v4339_v24  ;;  %v4533_v24 = vshrl.u32 %v718_v5, 7 }
 0x16f   : > { %1269 = vmatpush1.bf16.msra.mxu0 %v3781_v22  ;;  %1342 = vmatpush1.bf16.msra.mxu1 %v3784_v25  ;;  %v676_v0 = vmul.f32 %v3858_v60, %v4336_v23 }
 0x170   : > { %1270 = vmatprep.subr.bf16.mxu0 %v3789_v28  ;;  %1343 = vmatprep.subr.bf16.mxu1 %v3792_v29  ;;  %v720_v23 = vsub.s32 0, %v4533_v24  ;;  %v728_v6 = vsub.s32 2, %v4533_v24 }
 0x171   : > { %v682_v1 = vpack.c.bf16 %v677_v63, %v676_v0  ;;  %v3860_v16 = vpop.eup %3859 }
 0x172   : > { %961 = vmatmul.mubr.bf16.gmra.mrb[12].mxu0 %v591_v37  ;;  %1034 = vmatmul.mubr.bf16.gmra.mrb[12].mxu1 %v591_v37  ;;  %v679_v2 = vmul.f32 %v3860_v16, %v4361_v36  ;;  %v732_v36 = vsub.s32 3, %v4533_v24  ;;  %v4548_v8 = vrot.slane %v716_v7, %v728_v6 }
 0x173   : > { %1271 = vmatpush1.bf16.msra.mxu0 %v3787_v54  ;;  %1344 = vmatpush1.bf16.msra.mxu1 %v3790_v30  ;;  %v3862_v9 = vpop.eup %3861 }
 0x174   : > { %1272 = vmatprep.subr.bf16.mxu0 %v3795_v34  ;;  %1345 = vmatprep.subr.bf16.mxu1 %v3798_v53  ;;  %v678_v3 = vmul.f32 %v3862_v9, %v4358_v35  ;;  %v4544_v35 = vrot.slane %v716_v7, %v720_v23  ;;  %v4556_v19 = vrot.slane %v716_v7, %v732_v36 }
 0x175   : > { %1290 = vmatprep.mubr.bf16.mxu0 %v4047_v58  ;;  %1363 = vmatprep.mubr.bf16.mxu1 %v4047_v58 }
 0x176   : > { %v683_v4 = vpack.c.bf16 %v679_v2, %v678_v3 }
 0x177   : > { %1273 = vmatpush1.bf16.msra.mxu0 %v3793_v15  ;;  %1346 = vmatpush1.bf16.msra.mxu1 %v3796_v42 }
 0x17a   : > { %1291 = vmatmul.mubr.bf16.vlgmr.msra.gmra.mrb[16].mxu0 %v680_v38  ;;  %1364 = vmatmul.mubr.bf16.vlgmr.msra.gmra.mrb[16].mxu1 %v680_v38 }
 0x17b   : > { %1300 = vmatprep.mubr.bf16.mxu0 %v4047_v58  ;;  %1373 = vmatprep.mubr.bf16.mxu1 %v4047_v58 }
 0x182   : > { %1301 = vmatmul.mubr.bf16.gmra.mrb[20].mxu0 %v681_v57  ;;  %1374 = vmatmul.mubr.bf16.gmra.mrb[20].mxu1 %v681_v57 }
 0x183   : > { %1310 = vmatprep.mubr.bf16.mxu0 %v4047_v58  ;;  %1383 = vmatprep.mubr.bf16.mxu1 %v4047_v58 }
 0x18a   : > { %1311 = vmatmul.mubr.bf16.gmra.mrb[24].mxu0 %v682_v1  ;;  %1384 = vmatmul.mubr.bf16.gmra.mrb[24].mxu1 %v682_v1 }
 0x18b   : > { %1320 = vmatprep.mubr.bf16.mxu0 %v4047_v58  ;;  %1393 = vmatprep.mubr.bf16.mxu1 %v4047_v58  ;;  %v724_v58 = vsub.s32 1, %v4533_v24 }
 0x18d   : > { %v4552_v18 = vrot.slane %v716_v7, %v724_v58 }
 0x192   : > { %1321 = vmatmul.mubr.bf16.gmra.mrb[28].mxu0 %v683_v4  ;;  %1394 = vmatmul.mubr.bf16.gmra.mrb[28].mxu1 %v683_v4 }
 0x22d   : > { %v932_v46 = vpop.f32.mrb[0].mxu0  ;;  %v1005_v17 = vpop.f32.mrb[0].mxu1 }
 0x22e   : > { %v934_v45 = vpop.f32.mrb[1].mxu0  ;;  %v1007_v20 = vpop.f32.mrb[1].mxu1  ;;  %v933_v11 = vadd.f32 %v932_v46, %v4544_v35  ;;  %v1006_v22 = vadd.f32 %v1005_v17, %v4548_v8 }
 0x22f   : > { %v936_v10 = vpop.f32.mrb[2].mxu0  ;;  %v1009_v21 = vpop.f32.mrb[2].mxu1  ;;  %v4563_v29 = vadd.f32 %v934_v45, %v4552_v18  ;;  %v1008_v12 = vadd.f32 %v1007_v20, %v4556_v19 }
 0x230   : > { %v937_v25 = vadd.f32 %v936_v10, %v4544_v35  ;;  %v1010_v26 = vadd.f32 %v1009_v21, %v4548_v8  ;;  %v938_v27 = vpop.f32.mrb[3].mxu0  ;;  %v1011_v28 = vpop.f32.mrb[3].mxu1 }
 0x231   : > { %v4567_v13 = vadd.f32 %v938_v27, %v4552_v18  ;;  %v1012_v32 = vadd.f32 %v1011_v28, %v4556_v19 }
 0x232   : > { %v1404_v33 = vpack.c.bf16 %v937_v25, %v933_v11  ;;  %v4570_v54 = vpack.c.bf16 %v1010_v26, %v1006_v22 }
 0x233   : > { %v1963_v30 = vpack.c.bf16 %v4567_v13, %v4563_v29  ;;  %v4574_v37 = vpack.c.bf16 %v1012_v32, %v1008_v12 }
 0x234   : > { %3452 = vmatprep.mubr.bf16.mxu0 %v1404_v33 }
 0x235   : > { %v942_v34 = vpop.f32.mrb[4].mxu0  ;;  %v1015_v53 = vpop.f32.mrb[4].mxu1 }
 0x236   : > { %v1016_v39 = vadd.f32 %v1015_v53, %v4548_v8  ;;  %v944_v40 = vpop.f32.mrb[5].mxu0  ;;  %v1017_v41 = vpop.f32.mrb[5].mxu1  ;;  %v4579_v43 = vadd.f32 %v942_v34, %v4544_v35 }
 0x237   : > { %v1018_v14 = vadd.f32 %v1017_v41, %v4556_v19  ;;  %v946_v15 = vpop.f32.mrb[6].mxu0  ;;  %v1019_v42 = vpop.f32.mrb[6].mxu1  ;;  %v4586_v50 = vadd.f32 %v944_v40, %v4552_v18  ;;  %v1076_v40 = vld [vmem:[%s5244_s5] sm:$0xf] }
 0x238   : > { %v4582_v44 = vadd.f32 %v946_v15, %v4544_v35  ;;  %v1020_v47 = vadd.f32 %v1019_v42, %v4548_v8  ;;  %v948_v48 = vpop.f32.mrb[7].mxu0  ;;  %v1021_v49 = vpop.f32.mrb[7].mxu1 }
 0x239   : > { %v4589_v38 = vadd.f32 %v948_v48, %v4552_v18  ;;  %v1022_v51 = vadd.f32 %v1021_v49, %v4556_v19  ;;  %v4647_v48 = vrot.slane %v1076_v40, %v724_v58  ;;  %v4659_v49 = vrot.slane %v1076_v40, %v728_v6 }
 0x23a   : > { %v1405_v52 = vpack.c.bf16 %v4582_v44, %v4579_v43  ;;  %v4594_v62 = vpack.c.bf16 %v1020_v47, %v1016_v39 }
 0x23b   : > { %v1964_v55 = vpack.c.bf16 %v4589_v38, %v4586_v50  ;;  %v4598_v31 = vpack.c.bf16 %v1022_v51, %v1018_v14 }
 0x23d   : > { %v952_v61 = vpop.f32.mrb[8].mxu0  ;;  %v1025_v56 = vpop.f32.mrb[8].mxu1 }
 0x23e   : > { %v954_v57 = vpop.f32.mrb[9].mxu0  ;;  %v1027_v59 = vpop.f32.mrb[9].mxu1  ;;  %v953_v0 = vadd.f32 %v952_v61, %v4544_v35  ;;  %v1026_v1 = vadd.f32 %v1025_v56, %v4548_v8 }
 0x23f   : > { %v956_v60 = vpop.f32.mrb[10].mxu0  ;;  %v1029_v63 = vpop.f32.mrb[10].mxu1  ;;  %v4605_v4 = vadd.f32 %v954_v57, %v4552_v18  ;;  %v1028_v5 = vadd.f32 %v1027_v59, %v4556_v19 }
 0x240   : > { %v957_v16 = vadd.f32 %v956_v60, %v4544_v35  ;;  %v1030_v9 = vadd.f32 %v1029_v63, %v4548_v8  ;;  %v958_v2 = vpop.f32.mrb[11].mxu0  ;;  %v1031_v3 = vpop.f32.mrb[11].mxu1 }
 0x241   : > { %v4609_v7 = vadd.f32 %v958_v2, %v4552_v18  ;;  %v1032_v46 = vadd.f32 %v1031_v3, %v4556_v19 }
 0x242   : > { %v1406_v17 = vpack.c.bf16 %v957_v16, %v953_v0  ;;  %v4612_v45 = vpack.c.bf16 %v1030_v9, %v1026_v1 }
 0x243   : > { %v1965_v20 = vpack.c.bf16 %v4609_v7, %v4605_v4  ;;  %v4616_v10 = vpack.c.bf16 %v1032_v46, %v1028_v5 }
 0x244   : > { %3460 = vmatprep.mubr.bf16.mxu1 %v1406_v17 }
 0x245   : > { %v962_v21 = vpop.f32.mrb[12].mxu0  ;;  %v1035_v11 = vpop.f32.mrb[12].mxu1 }
 0x246   : > { %v4619_v22 = vadd.f32 %v962_v21, %v4544_v35  ;;  %v1036_v25 = vadd.f32 %v1035_v11, %v4548_v8  ;;  %v964_v26 = vpop.f32.mrb[13].mxu0  ;;  %v1037_v27 = vpop.f32.mrb[13].mxu1 }
 0x247   : > { %v1038_v28 = vadd.f32 %v1037_v27, %v4556_v19  ;;  %v966_v12 = vpop.f32.mrb[14].mxu0  ;;  %v1039_v32 = vpop.f32.mrb[14].mxu1  ;;  %v4631_v41 = vadd.f32 %v964_v26, %v4552_v18 }
 0x248   : > { %v4624_v33 = vadd.f32 %v966_v12, %v4544_v35  ;;  %v1040_v34 = vadd.f32 %v1039_v32, %v4548_v8  ;;  %v968_v53 = vpop.f32.mrb[15].mxu0  ;;  %v1041_v39 = vpop.f32.mrb[15].mxu1 }
 0x249   : > { %v4634_v14 = vadd.f32 %v968_v53, %v4552_v18  ;;  %v1042_v15 = vadd.f32 %v1041_v39, %v4556_v19  ;;  %v4651_v18 = vrot.slane %v1076_v40, %v732_v36  ;;  %v4655_v19 = vrot.slane %v1076_v40, %v720_v23 }
 0x24a   : > { %v1407_v35 = vpack.c.bf16 %v4624_v33, %v4619_v22  ;;  %v4639_v42 = vpack.c.bf16 %v1040_v34, %v1036_v25 }
 0x24b   : > { %v1966_v8 = vpack.c.bf16 %v4634_v14, %v4631_v41  ;;  %v4643_v47 = vpack.c.bf16 %v1042_v15, %v1038_v28 }
 0x24d   : > { %v1292_v51 = vpop.f32.mrb[16].mxu0  ;;  %v1365_v61 = vpop.f32.mrb[16].mxu1 }
 0x24e   : > { %v1294_v56 = vpop.f32.mrb[17].mxu0  ;;  %v1367_v57 = vpop.f32.mrb[17].mxu1  ;;  %v1293_v36 = vadd.f32 %v1292_v51, %v4655_v19  ;;  %v1366_v0 = vadd.f32 %v1365_v61, %v4659_v49 }
 0x24f   : > { %v1295_v59 = vadd.f32 %v1294_v56, %v4647_v48  ;;  %v1368_v58 = vadd.f32 %v1367_v57, %v4651_v18  ;;  %v1296_v60 = vpop.f32.mrb[18].mxu0  ;;  %v1369_v63 = vpop.f32.mrb[18].mxu1 }
 0x250   : > { %v1297_v23 = vadd.f32 %v1296_v60, %v4655_v19  ;;  %v1370_v24 = vadd.f32 %v1369_v63, %v4659_v49  ;;  %v1298_v6 = vpop.f32.mrb[19].mxu0  ;;  %v1371_v1 = vpop.f32.mrb[19].mxu1 }
 0x251   : > { %v1299_v16 = vadd.f32 %v1298_v6, %v4647_v48  ;;  %v1372_v9 = vadd.f32 %v1371_v1, %v4651_v18 }
 0x252   : > { %v1408_v2 = vpack.c.bf16 %v1297_v23, %v1293_v36  ;;  %v1416_v3 = vpack.c.bf16 %v1370_v24, %v1366_v0 }
 0x253   : > { %v4669_v5 = vpack.c.bf16 %v1299_v16, %v1295_v59  ;;  %v4671_v46 = vpack.c.bf16 %v1372_v9, %v1368_v58 }
 0x254   : > { %3448 = vmatprep.subr.bf16.mxu0 %v1408_v2 }
 0x255   : > { %v1302_v17 = vpop.f32.mrb[20].mxu0  ;;  %v1375_v21 = vpop.f32.mrb[20].mxu1  ;;  %3449 = vmatpush3.bf16.xpose.msra.mxu0 %v1408_v2 }
 0x256   : > { %v1304_v11 = vpop.f32.mrb[21].mxu0  ;;  %v1377_v25 = vpop.f32.mrb[21].mxu1  ;;  %v1303_v32 = vadd.f32 %v1302_v17, %v4655_v19  ;;  %v1376_v34 = vadd.f32 %v1375_v21, %v4659_v49 }
 0x257   : > { %v1305_v26 = vadd.f32 %v1304_v11, %v4647_v48  ;;  %v1378_v27 = vadd.f32 %v1377_v25, %v4651_v18  ;;  %v1306_v28 = vpop.f32.mrb[22].mxu0  ;;  %v1379_v12 = vpop.f32.mrb[22].mxu1 }
 0x258   : > { %v1307_v53 = vadd.f32 %v1306_v28, %v4655_v19  ;;  %v1380_v39 = vadd.f32 %v1379_v12, %v4659_v49  ;;  %v1308_v40 = vpop.f32.mrb[23].mxu0  ;;  %v1381_v15 = vpop.f32.mrb[23].mxu1 }
 0x259   : > { %v1309_v51 = vadd.f32 %v1308_v40, %v4647_v48  ;;  %v1382_v61 = vadd.f32 %v1381_v15, %v4651_v18 }
 0x25a   : > { %v1409_v56 = vpack.c.bf16 %v1307_v53, %v1303_v32  ;;  %v1417_v57 = vpack.c.bf16 %v1380_v39, %v1376_v34 }
 0x25b   : > { %v4681_v59 = vpack.c.bf16 %v1309_v51, %v1305_v26  ;;  %v4683_v58 = vpack.c.bf16 %v1382_v61, %v1378_v27 }
 0x25c   : > { %3450 = vmatprep.subr.bf16.mxu0 %v1409_v56 }
 0x25d   : > { %v1312_v60 = vpop.f32.mrb[24].mxu0  ;;  %v1385_v63 = vpop.f32.mrb[24].mxu1  ;;  %3451 = vmatpush3.bf16.xpose.msra.mxu0 %v1409_v56 }
 0x25e   : > { %v1314_v36 = vpop.f32.mrb[25].mxu0  ;;  %v1387_v0 = vpop.f32.mrb[25].mxu1  ;;  %3464 = vmatprep.subr.bf16.mxu0 %v1416_v3  ;;  %v1313_v16 = vadd.f32 %v1312_v60, %v4655_v19  ;;  %v1386_v9 = vadd.f32 %v1385_v63, %v4659_v49 }
 0x25f   : > { %v1315_v23 = vadd.f32 %v1314_v36, %v4647_v48  ;;  %v1388_v24 = vadd.f32 %v1387_v0, %v4651_v18  ;;  %v1316_v6 = vpop.f32.mrb[26].mxu0  ;;  %v1389_v1 = vpop.f32.mrb[26].mxu1 }
 0x260   : > { %v1317_v2 = vadd.f32 %v1316_v6, %v4655_v19  ;;  %v1390_v17 = vadd.f32 %v1389_v1, %v4659_v49  ;;  %v1318_v21 = vpop.f32.mrb[27].mxu0  ;;  %v1391_v11 = vpop.f32.mrb[27].mxu1 }
 0x261   : > { %v1319_v25 = vadd.f32 %v1318_v21, %v4647_v48  ;;  %v1392_v26 = vadd.f32 %v1391_v11, %v4651_v18 }
 0x262   : > { %v1410_v27 = vpack.c.bf16 %v1317_v2, %v1313_v16  ;;  %v1418_v28 = vpack.c.bf16 %v1390_v17, %v1386_v9 }
 0x263   : > { %v4693_v12 = vpack.c.bf16 %v1319_v25, %v1315_v23  ;;  %v4695_v32 = vpack.c.bf16 %v1392_v26, %v1388_v24 }
 0x264   : > { %3453 = vmatmul.mubr.bf16.vlgmr.msra.gmra.mrb[32].mxu0 %v1405_v52  ;;  %3456 = vmatprep.subr.bf16.mxu1 %v1410_v27 }
 0x265   : > { %v1322_v34 = vpop.f32.mrb[28].mxu0  ;;  %v1395_v53 = vpop.f32.mrb[28].mxu1  ;;  %3457 = vmatpush3.bf16.xpose.msra.mxu1 %v1410_v27  ;;  %3465 = vmatpush3.bf16.msra.mxu0 %v1416_v3 }
 0x266   : > { %v1324_v39 = vpop.f32.mrb[29].mxu0  ;;  %v1397_v40 = vpop.f32.mrb[29].mxu1  ;;  %3466 = vmatprep.subr.bf16.mxu0 %v1417_v57  ;;  %v1323_v60 = vadd.f32 %v1322_v34, %v4655_v19  ;;  %v1396_v63 = vadd.f32 %v1395_v53, %v4659_v49 }
 0x267   : > { %v1325_v15 = vadd.f32 %v1324_v39, %v4647_v48  ;;  %v1398_v51 = vadd.f32 %v1397_v40, %v4651_v18  ;;  %v1326_v61 = vpop.f32.mrb[30].mxu0  ;;  %v1399_v56 = vpop.f32.mrb[30].mxu1 }
 0x268   : > { %v1327_v43 = vadd.f32 %v1326_v61, %v4655_v19  ;;  %v1400_v44 = vadd.f32 %v1399_v56, %v4659_v49  ;;  %v1328_v52 = vpop.f32.mrb[31].mxu0  ;;  %v1401_v36 = vpop.f32.mrb[31].mxu1 }
 0x269   : > { %v1329_v3 = vadd.f32 %v1328_v52, %v4647_v48  ;;  %v1402_v0 = vadd.f32 %v1401_v36, %v4651_v18  ;;  %3467 = vmatpush3.bf16.msra.mxu0 %v1417_v57 }
 0x26a   : > { %v1411_v23 = vpack.c.bf16 %v1327_v43, %v1323_v60  ;;  %v1419_v24 = vpack.c.bf16 %v1400_v44, %v1396_v63  ;;  %3480 = vmatprep.subr.bf16.mxu0 %v4570_v54 }
 0x26b   : > { %v4709_v6 = vpack.c.bf16 %v1329_v3, %v1325_v15  ;;  %v4711_v1 = vpack.c.bf16 %v1402_v0, %v1398_v51 }
 0x26c   : > { %3458 = vmatprep.subr.bf16.mxu1 %v1411_v23 }
 0x26d   : > { %3459 = vmatpush3.bf16.xpose.msra.mxu1 %v1411_v23 }
 0x26e   : > { %3472 = vmatprep.subr.bf16.mxu1 %v1418_v28 }
 0x274   : > { %3461 = vmatmul.mubr.bf16.vlgmr.msra.gmra.mrb[32].mxu1 %v1407_v35 }
 0x275   : > { %3473 = vmatpush3.bf16.msra.mxu1 %v1418_v28 }
 0x276   : > { %3474 = vmatprep.subr.bf16.mxu1 %v1419_v24 }
 0x279   : > { %3475 = vmatpush3.bf16.msra.mxu1 %v1419_v24 }
 0x27a   : > { %3488 = vmatprep.subr.bf16.mxu1 %v4612_v45 }
 0x337   : > { %v3454_v48 = vpop.f32.mrb[32].mxu0 }
 0x338   : > { %v1454_v18 = vpop.f32.mrb[33].mxu0  ;;  %v1525_v9 = vsel %vm1518_vm0, %v3454_v48, -inf }
 0x339   : > { %v3455_v19 = vpop.f32.mrb[34].mxu0  ;;  %v1519_v49 = vsel %vm1518_vm0, %v1454_v18, -inf }
 0x33a   : > { %1520 = vmax.xlane.f32.xlu0 %v1519_v49  ;;  %v1457_v57 = vpop.f32.mrb[35].mxu0  ;;  %v1528_v22 = vsel %vm1518_vm0, %v3455_v19, -inf }
 0x33b   : > { %v1522_v16 = vsel %vm1518_vm0, %v1457_v57, -inf }
 0x33c   : > { %1523 = vmax.xlane.f32.xlu1 %v1522_v16 }
 0x33e   : > { %1526 = vmax.xlane.f32.xlu0 %v1525_v9 }
 0x340   : > { %1529 = vmax.xlane.f32.xlu1 %v1528_v22 }
 0x347   : > { %v4721_v33 = vpop.f32.mrb[32].mxu1 }
 0x348   : > { %v1503_v35 = vpop.f32.mrb[33].mxu1  ;;  %v1537_v25 = vsel %vm1518_vm0, %v4721_v33, -inf }
 0x349   : > { %v4723_v2 = vpop.f32.mrb[34].mxu1  ;;  %v1531_v17 = vsel %vm1518_vm0, %v1503_v35, -inf }
 0x34a   : > { %1532 = vmax.xlane.f32.xlu0 %v1531_v17  ;;  %v1506_v21 = vpop.f32.mrb[35].mxu1  ;;  %v1540_v26 = vsel %vm1518_vm0, %v4723_v2, -inf }
 0x34b   : > { %v1534_v11 = vsel %vm1518_vm0, %v1506_v21, -inf }
 0x34c   : > { %1535 = vmax.xlane.f32.xlu1 %v1534_v11 }
 0x34e   : > { %1538 = vmax.xlane.f32.xlu0 %v1537_v25 }
 0x350   : > { %1541 = vmax.xlane.f32.xlu1 %v1540_v26 }
 0x3c7   : > { %v1521_v27 = vpop.xlane.xlu0 %1520 }
 0x3c9   : > { %v1524_v28 = vpop.xlane.xlu1 %1523 }
 0x3cb   : > { %v1527_v34 = vpop.xlane.xlu0 %1526 }
 0x3cc   : > { %v1543_v39 = vmax.f32 %v1521_v27, %v1527_v34 }
 0x3cd   : > { %v1530_v53 = vpop.xlane.xlu1 %1529 }
 0x3ce   : > { %v1544_v40 = vmax.f32 %v1524_v28, %v1530_v53 }
 0x3d0   : > { %v1545_v15 = vmax.f32 %v1543_v39, %v1544_v40 }
 0x3d2   : > { %v1546_v51 = vrot.slane %v1545_v15, 4 }
 0x3d4   : > { %v1547_v61 = vmax.f32 %v1545_v15, %v1546_v51 }
 0x3d6   : > { %v1548_v56 = vrot.slane %v1547_v61, 2 }
 0x3d7   : > { %v1533_v60 = vpop.xlane.xlu0 %1532 }
 0x3d8   : > { %v1549_v63 = vmax.f32 %v1547_v61, %v1548_v56 }
 0x3d9   : > { %v1536_v43 = vpop.xlane.xlu1 %1535 }
 0x3da   : > { %v1550_v44 = vrot.slane %v1549_v63, 1 }
 0x3db   : > { %v1539_v36 = vpop.xlane.xlu0 %1538 }
 0x3dc   : > { %v1551_v52 = vmax.f32 %v1549_v63, %v1550_v44  ;;  %v1552_v16 = vmax.f32 %v1533_v60, %v1539_v36 }
 0x3dd   : > { %v1542_v3 = vpop.xlane.xlu1 %1541 }
 0x3de   : > { %v1561_v0 = vsub.f32 %v1454_v18, %v1551_v52  ;;  %v1562_v23 = vsub.f32 %v1457_v57, %v1551_v52  ;;  %v1563_v24 = vsub.f32 %v3454_v48, %v1551_v52  ;;  %v1564_v49 = vsub.f32 %v3455_v19, %v1551_v52 }
 0x3df   : > { %v1553_v9 = vmax.f32 %v1536_v43, %v1542_v3 }
 0x3e0   : > { %v1569_v22 = vmul.f32 1.442695, %v1561_v0  ;;  %v1571_v17 = vmul.f32 1.442695, %v1562_v23  ;;  %v1573_v11 = vmul.f32 1.442695, %v1563_v24 }
 0x3e1   : > { %v1575_v25 = vmul.f32 1.442695, %v1564_v49  ;;  %v1554_v26 = vmax.f32 %v1552_v16, %v1553_v9 }
 0x3e2   : > { %3863 = vpow2.f32 %v1569_v22 }
 0x3e3   : > { %3865 = vpow2.f32 %v1571_v17  ;;  %v1555_v27 = vrot.slane %v1554_v26, 4 }
 0x3e4   : > { %3867 = vpow2.f32 %v1573_v11 }
 0x3e5   : > { %3869 = vpow2.f32 %v1575_v25  ;;  %v1556_v28 = vmax.f32 %v1554_v26, %v1555_v27 }
 0x3e7   : > { %v1557_v34 = vrot.slane %v1556_v28, 2 }
 0x3e9   : > { %v1558_v53 = vmax.f32 %v1556_v28, %v1557_v34 }
 0x3eb   : > { %v1559_v39 = vrot.slane %v1558_v53, 1 }
 0x3ec   : > { %v4731_v18 = vpop.eup %3863 }
 0x3ed   : > { %v4733_v48 = vpop.eup %3865  ;;  %v1560_v19 = vmax.f32 %v1558_v53, %v1559_v39  ;;  %v1585_v57 = vsel %vm1518_vm0, %v4731_v18, 0.0 }
 0x3ee   : > { %v4737_v40 = vpop.eup %3867  ;;  %1586 = vadd.xlane.f32.xlu0 %v1585_v57  ;;  %v1588_v15 = vsel %vm1518_vm0, %v4733_v48, 0.0 }
 0x3ef   : > { %v4741_v51 = vpop.eup %3869  ;;  %v1565_v61 = vsub.f32 %v1503_v35, %v1560_v19  ;;  %v1566_v56 = vsub.f32 %v1506_v21, %v1560_v19  ;;  %v1567_v60 = vsub.f32 %v4721_v33, %v1560_v19  ;;  %v1568_v63 = vsub.f32 %v4723_v2, %v1560_v19  ;;  %1589 = vadd.xlane.f32.xlu1 %v1588_v15 }
 0x3f0   : > { %v1591_v43 = vsel %vm1518_vm0, %v4737_v40, 0.0  ;;  %v1594_v0 = vsel %vm1518_vm0, %v4741_v51, 0.0  ;;  %v1609_v35 = vadd.f32 %v1588_v15, %v1585_v57 }
 0x3f1   : > { %v1577_v44 = vmul.f32 1.442695, %v1565_v61  ;;  %v1579_v52 = vmul.f32 1.442695, %v1566_v56  ;;  %v1581_v36 = vmul.f32 1.442695, %v1567_v60 }
 0x3f2   : > { %v1583_v3 = vmul.f32 1.442695, %v1568_v63  ;;  %1592 = vadd.xlane.f32.xlu0 %v1591_v43  ;;  %v1610_v33 = vadd.f32 %v1609_v35, %v1591_v43 }
 0x3f3   : > { %3871 = vpow2.f32 %v1577_v44  ;;  %1595 = vadd.xlane.f32.xlu1 %v1594_v0 }
 0x3f4   : > { %3873 = vpow2.f32 %v1579_v52  ;;  %v1611_v21 = vadd.f32 %v1610_v33, %v1594_v0 }
 0x3f5   : > { %3875 = vpow2.f32 %v1581_v36 }
 0x3f6   : > { %3877 = vpow2.f32 %v1583_v3  ;;  %v1612_v17 = vrot.slane %v1611_v21, 4 }
 0x3f8   : > { %v1613_v28 = vadd.f32 %v1612_v17, %v1611_v21 }
 0x3fa   : > { %v1614_v39 = vrot.slane %v1613_v28, 2 }
 0x3fc   : > { %v1615_v57 = vadd.f32 %v1614_v39, %v1613_v28 }
 0x3fd   : > { %v4749_v2 = vpop.eup %3871 }
 0x3fe   : > { %v4751_v23 = vpop.eup %3873  ;;  %v1597_v24 = vsel %vm1518_vm0, %v4749_v2, 0.0  ;;  %v1616_v61 = vrot.slane %v1615_v57, 1 }
 0x3ff   : > { %v4755_v49 = vpop.eup %3875  ;;  %v1600_v16 = vsel %vm1518_vm0, %v4751_v23, 0.0  ;;  %1598 = vadd.xlane.f32.xlu0 %v1597_v24 }
 0x400   : > { %v4759_v9 = vpop.eup %3877  ;;  %1601 = vadd.xlane.f32.xlu1 %v1600_v16  ;;  %v1618_v22 = vadd.f32 %v1600_v16, %v1597_v24  ;;  %v1603_v11 = vsel %vm1518_vm0, %v4755_v49, 0.0  ;;  %v1617_v60 = vadd.f32 %v1616_v61, %v1615_v57 }
 0x401   : > { %v1606_v26 = vsel %vm1518_vm0, %v4759_v9, 0.0 }
 0x402   : > { %v1619_v25 = vadd.f32 %v1618_v22, %v1603_v11  ;;  %v1651_v43 = vmax.f32 %v1617_v60, 1e-30 }
 0x403   : > { %1604 = vadd.xlane.f32.xlu0 %v1603_v11 }
 0x404   : > { %1607 = vadd.xlane.f32.xlu1 %v1606_v26  ;;  %v1620_v27 = vadd.f32 %v1619_v25, %v1606_v26  ;;  %3879 = vrcp.f32 %v1651_v43 }
 0x406   : > { %v1621_v34 = vrot.slane %v1620_v27, 4 }
 0x408   : > { %v1622_v53 = vadd.f32 %v1621_v34, %v1620_v27 }
 0x40a   : > { %v1623_v19 = vrot.slane %v1622_v53, 2 }
 0x40c   : > { %v1624_v15 = vadd.f32 %v1623_v19, %v1622_v53 }
 0x40e   : > { %v1625_v56 = vrot.slane %v1624_v15, 1  ;;  %v3880_v52 = vpop.eup %3879 }
 0x40f   : > { %v1655_v3 = vmul.f32 %v3880_v52, %v4731_v18  ;;  %v1656_v0 = vmul.f32 %v3880_v52, %v4733_v48  ;;  %v1657_v24 = vmul.f32 %v3880_v52, %v4737_v40  ;;  %v1658_v16 = vmul.f32 %v3880_v52, %v4741_v51 }
 0x410   : > { %v1626_v63 = vadd.f32 %v1625_v56, %v1624_v15 }
 0x411   : > { %v1777_v21 = vpack.c.bf16 %v1656_v0, %v1655_v3  ;;  %v1778_v25 = vpack.c.bf16 %v1658_v16, %v1657_v24 }
 0x412   : > { %v1652_v44 = vmax.f32 %v1626_v63, 1e-30 }
 0x414   : > { %3881 = vrcp.f32 %v1652_v44 }
 0x41e   : > { %v3882_v36 = vpop.eup %3881 }
 0x41f   : > { %v1659_v35 = vmul.f32 %v3882_v36, %v4749_v2  ;;  %v1660_v33 = vmul.f32 %v3882_v36, %v4751_v23  ;;  %v1661_v17 = vmul.f32 %v3882_v36, %v4755_v49  ;;  %v1662_v11 = vmul.f32 %v3882_v36, %v4759_v9 }
 0x421   : > { %v1779_v22 = vpack.c.bf16 %v1660_v33, %v1659_v35  ;;  %v1780_v26 = vpack.c.bf16 %v1662_v11, %v1661_v17 }
 0x430   : > { %1781 = vxpose.xlu0.c.b16.start [1/2] (short) (narrow) %v1777_v21, 32 }
 0x431   : > { %1852 = vxpose.xlu1.c.b16.start [1/2] (short) (narrow) %v1779_v22, 32 }
 0x434   : > { %1782 = vxpose.xlu0.c.b16.end [2/2] (short) (narrow) %v1778_v25, 32 }
 0x435   : > { %1853 = vxpose.xlu1.c.b16.end [2/2] (short) (narrow) %v1780_v26, 32 }
 0x47b   : > { %v1587_v27 = vpop.xlane.xlu0 %1586 }
 0x47c   : > { %v1627_v28 = vmax.f32 %v1587_v27, 1e-30  ;;  %v1590_v34 = vpop.xlane.xlu1 %1589 }
 0x47d   : > { %v1628_v53 = vmax.f32 %v1590_v34, 1e-30 }
 0x47e   : > { %3883 = vrcp.f32 %v1627_v28 }
 0x47f   : > { %3885 = vrcp.f32 %v1628_v53  ;;  %v1593_v39 = vpop.xlane.xlu0 %1592 }
 0x480   : > { %v1629_v19 = vmax.f32 %v1593_v39, 1e-30  ;;  %v1596_v57 = vpop.xlane.xlu1 %1595 }
 0x481   : > { %v1630_v15 = vmax.f32 %v1596_v57, 1e-30 }
 0x482   : > { %3887 = vrcp.f32 %v1629_v19 }
 0x483   : > { %3889 = vrcp.f32 %v1630_v15 }
 0x488   : > { %v3884_v61 = vpop.eup %3883 }
 0x489   : > { %v3886_v56 = vpop.eup %3885  ;;  %v1643_v60 = vmul.f32 %v3884_v61, %v4731_v18 }
 0x48a   : > { %v1644_v63 = vmul.f32 %v3886_v56, %v4733_v48 }
 0x48c   : > { %v3888_v43 = vpop.eup %3887  ;;  %v1599_v44 = vpop.xlane.xlu0 %1598  ;;  %v1663_v52 = vpack.c.bf16 %v1644_v63, %v1643_v60 }
 0x48d   : > { %v3890_v36 = vpop.eup %3889  ;;  %v1645_v3 = vmul.f32 %v3888_v43, %v4737_v40  ;;  %v1631_v0 = vmax.f32 %v1599_v44, 1e-30  ;;  %v1602_v35 = vpop.xlane.xlu1 %1601 }
 0x48e   : > { %v1646_v33 = vmul.f32 %v3890_v36, %v4741_v51  ;;  %v1632_v21 = vmax.f32 %v1602_v35, 1e-30  ;;  %3468 = vmatprep.mubr.msk.bf16.mxu0 %vm1518_vm0, %v1663_v52 }
 0x48f   : > { %3891 = vrcp.f32 %v1631_v0 }
 0x490   : > { %3893 = vrcp.f32 %v1632_v21  ;;  %v1605_v24 = vpop.xlane.xlu0 %1604  ;;  %v1664_v16 = vpack.c.bf16 %v1646_v33, %v1645_v3 }
 0x491   : > { %v1633_v18 = vmax.f32 %v1605_v24, 1e-30  ;;  %v1608_v22 = vpop.xlane.xlu1 %1607 }
 0x492   : > { %v1634_v48 = vmax.f32 %v1608_v22, 1e-30  ;;  %3469 = vmatmul.mubr.msk.bf16.vlgmr.msra.gmra.mrb[36].mxu0 %vm1518_vm0, %v1664_v16 }
 0x493   : > { %3895 = vrcp.f32 %v1633_v18  ;;  %3481 = vmatpush3.bf16.msra.mxu0 %v4570_v54 }
 0x494   : > { %3897 = vrcp.f32 %v1634_v48  ;;  %3482 = vmatprep.subr.bf16.mxu0 %v4594_v62 }
 0x496   : > { %v1789_v40 = vpop.trf.xlu0 }
 0x497   : > { %3483 = vmatpush3.bf16.msra.mxu0 %v4594_v62  ;;  %3484 = vmatprep.mubr.msk.bf16.mxu0 %vm1518_vm0, %v1789_v40  ;;  %v1860_v53 = vpop.trf.xlu1 }
 0x498   : > { %3496 = vmatprep.subr.bf16.mxu0 %v4669_v5 }
 0x499   : > { %v3892_v51 = vpop.eup %3891 }
 0x49a   : > { %v3894_v17 = vpop.eup %3893  ;;  %v1790_v11 = vpop.trf.xlu0  ;;  %v1647_v25 = vmul.f32 %v3892_v51, %v4749_v2 }
 0x49b   : > { %3485 = vmatmul.mubr.msk.bf16.vlgmr.msra.gmra.mrb[40].mxu0 %vm1518_vm0, %v1790_v11  ;;  %v1648_v26 = vmul.f32 %v3894_v17, %v4751_v23  ;;  %v1861_v29 = vpop.trf.xlu1 }
 0x49c   : > { %3500 = vmatprep.mubr.bf16.mxu0 %v1963_v30 }
 0x49d   : > { %v3896_v54 = vpop.eup %3895  ;;  %v1665_v27 = vpack.c.bf16 %v1648_v26, %v1647_v25 }
 0x49e   : > { %v3898_v62 = vpop.eup %3897  ;;  %v1649_v28 = vmul.f32 %v3896_v54, %v4755_v49 }
 0x49f   : > { %v1650_v34 = vmul.f32 %v3898_v62, %v4759_v9  ;;  %3476 = vmatprep.mubr.msk.bf16.mxu1 %vm1518_vm0, %v1665_v27 }
 0x4a0   : > { %3497 = vmatpush3.bf16.xpose.msra.mxu0 %v4669_v5 }
 0x4a1   : > { %3498 = vmatprep.subr.bf16.mxu0 %v4681_v59  ;;  %v1666_v2 = vpack.c.bf16 %v1650_v34, %v1649_v28 }
 0x4a3   : > { %3477 = vmatmul.mubr.msk.bf16.vlgmr.msra.gmra.mrb[36].mxu1 %vm1518_vm0, %v1666_v2 }
 0x4a4   : > { %3489 = vmatpush3.bf16.msra.mxu1 %v4612_v45  ;;  %3492 = vmatprep.mubr.msk.bf16.mxu1 %vm1518_vm0, %v1860_v53 }
 0x4a5   : > { %3490 = vmatprep.subr.bf16.mxu1 %v4639_v42 }
 0x4a8   : > { %3491 = vmatpush3.bf16.msra.mxu1 %v4639_v42  ;;  %3499 = vmatpush3.bf16.xpose.msra.mxu0 %v4681_v59 }
 0x4a9   : > { %3504 = vmatprep.subr.bf16.mxu1 %v4693_v12  ;;  %3512 = vmatprep.subr.bf16.mxu0 %v4671_v46 }
 0x4ab   : > { %3493 = vmatmul.mubr.msk.bf16.vlgmr.msra.gmra.mrb[40].mxu1 %vm1518_vm0, %v1861_v29 }
 0x4ac   : > { %3508 = vmatprep.mubr.bf16.mxu1 %v1965_v20 }
 0x4af   : > { %3501 = vmatmul.mubr.bf16.vlgmr.msra.gmra.mrb[44].mxu0 %v1964_v55 }
 0x4b0   : > { %3513 = vmatpush3.bf16.msra.mxu0 %v4671_v46 }
 0x4b1   : > { %3505 = vmatpush3.bf16.xpose.msra.mxu1 %v4693_v12  ;;  %3514 = vmatprep.subr.bf16.mxu0 %v4683_v58 }
 0x4b2   : > { %3506 = vmatprep.subr.bf16.mxu1 %v4709_v6 }
 0x4b4   : > { %3515 = vmatpush3.bf16.msra.mxu0 %v4683_v58 }
 0x4b5   : > { %3528 = vmatprep.subr.bf16.mxu0 %v4574_v37 }
 0x4b9   : > { %3507 = vmatpush3.bf16.xpose.msra.mxu1 %v4709_v6 }
 0x4ba   : > { %3520 = vmatprep.subr.bf16.mxu1 %v4695_v32 }
 0x4c0   : > { %3509 = vmatmul.mubr.bf16.vlgmr.msra.gmra.mrb[44].mxu1 %v1966_v8 }
 0x4c1   : > { %3521 = vmatpush3.bf16.msra.mxu1 %v4695_v32 }
 0x4c2   : > { %3522 = vmatprep.subr.bf16.mxu1 %v4711_v1 }
 0x4c5   : > { %3523 = vmatpush3.bf16.msra.mxu1 %v4711_v1 }
 0x4c6   : > { %3536 = vmatprep.subr.bf16.mxu1 %v4616_v10 }
 0x565   : > { %v4825_v13 = vpop.f32.mrb[36].mxu0 }
 0x566   : > { %v4827_v30 = vpop.f32.mrb[37].mxu0 }
 0x567   : > { %v4829_v50 = vpop.f32.mrb[38].mxu0 }
 0x568   : > { %v1924_v38 = vpack.c.bf16 %v4829_v50, %v4825_v13  ;;  %v4833_v55 = vpop.f32.mrb[39].mxu0  ;;  %v3332_v13 = vld [vmem:[%s5246_s7] ss:$0 sm:$0xff] }
 0x569   : > { %v1923_v4 = vpack.c.bf16 %v4833_v55, %v4827_v30  ;;  %v3827_v30 = vld [vmem:[%s5245_s6 + $0x38] sm:$0xff]   ;;  %v3828_v55 = vld [vmem:[%s5247_s8 + $0x28] sm:$0xff]  }
 0x56e   : > { %v4837_v7 = vpop.f32.mrb[40].mxu0 }
 0x56f   : > { %v4839_v45 = vpop.f32.mrb[41].mxu0 }
 0x570   : > { %v4841_v20 = vpop.f32.mrb[42].mxu0 }
 0x571   : > { %v1944_v41 = vpack.c.bf16 %v4841_v20, %v4837_v7  ;;  %v4845_v14 = vpop.f32.mrb[43].mxu0 }
 0x572   : > { %v1943_v42 = vpack.c.bf16 %v4845_v14, %v4839_v45 }
 0x576   : > { %v4849_v8 = vpop.f32.mrb[36].mxu1 }
 0x577   : > { %v4851_v5 = vpop.f32.mrb[37].mxu1 }
 0x578   : > { %v4853_v46 = vpop.f32.mrb[38].mxu1 }
 0x579   : > { %v1926_v59 = vpack.c.bf16 %v4853_v46, %v4849_v8  ;;  %v4857_v58 = vpop.f32.mrb[39].mxu1 }
 0x57a   : > { %v1925_v12 = vpack.c.bf16 %v4857_v58, %v4851_v5 }
 0x57e   : > { %v4861_v32 = vpop.f32.mrb[40].mxu1 }
 0x57f   : > { %v4863_v6 = vpop.f32.mrb[41].mxu1 }
 0x580   : > { %v4865_v1 = vpop.f32.mrb[42].mxu1 }
 0x581   : > { %v1946_v23 = vpack.c.bf16 %v4865_v1, %v4861_v32  ;;  %v4869_v49 = vpop.f32.mrb[43].mxu1  ;;  %v3936_v32 = vld [vmem:[%s4174_s24] sm:$0xff] }
 0x582   : > { %v3502_v9 = vpop.f32.mrb[44].mxu0  ;;  %v1945_v39 = vpack.c.bf16 %v4869_v49, %v4863_v6 }
 0x583   : > { %v2013_v19 = vpop.f32.mrb[45].mxu0  ;;  %v2083_v60 = vsel %vm1518_vm0, %v3502_v9, -inf }
 0x584   : > { %v3503_v57 = vpop.f32.mrb[46].mxu0  ;;  %v2077_v15 = vsel %vm1518_vm0, %v2013_v19, -inf }
 0x585   : > { %2078 = vmax.xlane.f32.xlu0 %v2077_v15  ;;  %v2016_v61 = vpop.f32.mrb[47].mxu0  ;;  %v2086_v63 = vsel %vm1518_vm0, %v3503_v57, -inf }
 0x586   : > { %v2080_v56 = vsel %vm1518_vm0, %v2016_v61, -inf }
 0x587   : > { %2081 = vmax.xlane.f32.xlu1 %v2080_v56 }
 0x589   : > { %2084 = vmax.xlane.f32.xlu0 %v2083_v60 }
 0x58b   : > { %2087 = vmax.xlane.f32.xlu1 %v2086_v63 }
 0x593   : > { %v4877_v43 = vpop.f32.mrb[44].mxu1 }
 0x594   : > { %v2062_v44 = vpop.f32.mrb[45].mxu1  ;;  %v2095_v35 = vsel %vm1518_vm0, %v4877_v43, -inf }
 0x595   : > { %v4879_v52 = vpop.f32.mrb[46].mxu1  ;;  %v2089_v36 = vsel %vm1518_vm0, %v2062_v44, -inf }
 0x596   : > { %2090 = vmax.xlane.f32.xlu0 %v2089_v36  ;;  %v2065_v3 = vpop.f32.mrb[47].mxu1  ;;  %v2098_v33 = vsel %vm1518_vm0, %v4879_v52, -inf }
 0x597   : > { %v2092_v0 = vsel %vm1518_vm0, %v2065_v3, -inf }
 0x598   : > { %2093 = vmax.xlane.f32.xlu1 %v2092_v0 }
 0x59a   : > { %2096 = vmax.xlane.f32.xlu0 %v2095_v35 }
 0x59c   : > { %2099 = vmax.xlane.f32.xlu1 %v2098_v33 }
 0x612   : > { %v2079_v21 = vpop.xlane.xlu0 %2078 }
 0x614   : > { %v2082_v24 = vpop.xlane.xlu1 %2081 }
 0x616   : > { %v2085_v16 = vpop.xlane.xlu0 %2084 }
 0x617   : > { %v2101_v22 = vmax.f32 %v2079_v21, %v2085_v16 }
 0x618   : > { %v2088_v18 = vpop.xlane.xlu1 %2087 }
 0x619   : > { %v2102_v48 = vmax.f32 %v2082_v24, %v2088_v18 }
 0x61b   : > { %v2103_v40 = vmax.f32 %v2101_v22, %v2102_v48 }
 0x61d   : > { %v2104_v51 = vrot.slane %v2103_v40, 4 }
 0x61f   : > { %v2105_v17 = vmax.f32 %v2103_v40, %v2104_v51 }
 0x621   : > { %v2106_v11 = vrot.slane %v2105_v17, 2 }
 0x623   : > { %v2107_v25 = vmax.f32 %v2105_v17, %v2106_v11  ;;  %v2091_v26 = vpop.xlane.xlu0 %2090 }
 0x625   : > { %v2108_v54 = vrot.slane %v2107_v25, 1  ;;  %v2094_v27 = vpop.xlane.xlu1 %2093 }
 0x627   : > { %v2109_v62 = vmax.f32 %v2107_v25, %v2108_v54  ;;  %v2097_v28 = vpop.xlane.xlu0 %2096 }
 0x628   : > { %v2110_v56 = vmax.f32 %v2091_v26, %v2097_v28 }
 0x629   : > { %v2119_v34 = vsub.f32 %v2013_v19, %v2109_v62  ;;  %v2120_v2 = vsub.f32 %v2016_v61, %v2109_v62  ;;  %v2121_v53 = vsub.f32 %v3502_v9, %v2109_v62  ;;  %v2122_v29 = vsub.f32 %v3503_v57, %v2109_v62  ;;  %v2100_v15 = vpop.xlane.xlu1 %2099 }
 0x62a   : > { %v2111_v60 = vmax.f32 %v2094_v27, %v2100_v15 }
 0x62b   : > { %v2127_v63 = vmul.f32 1.442695, %v2119_v34  ;;  %v2129_v36 = vmul.f32 1.442695, %v2120_v2  ;;  %v2131_v0 = vmul.f32 1.442695, %v2121_v53 }
 0x62c   : > { %v2133_v35 = vmul.f32 1.442695, %v2122_v29  ;;  %v2112_v33 = vmax.f32 %v2110_v56, %v2111_v60 }
 0x62d   : > { %3899 = vpow2.f32 %v2127_v63 }
 0x62e   : > { %3901 = vpow2.f32 %v2129_v36  ;;  %v2113_v21 = vrot.slane %v2112_v33, 4 }
 0x62f   : > { %3903 = vpow2.f32 %v2131_v0 }
 0x630   : > { %3905 = vpow2.f32 %v2133_v35  ;;  %v2114_v24 = vmax.f32 %v2112_v33, %v2113_v21 }
 0x632   : > { %v2115_v16 = vrot.slane %v2114_v24, 2 }
 0x634   : > { %v2116_v18 = vmax.f32 %v2114_v24, %v2115_v16 }
 0x636   : > { %v2117_v19 = vrot.slane %v2116_v18, 1 }
 0x637   : > { %v4887_v61 = vpop.eup %3899 }
 0x638   : > { %v4889_v9 = vpop.eup %3901  ;;  %v2118_v57 = vmax.f32 %v2116_v18, %v2117_v19  ;;  %v2143_v22 = vsel %vm1518_vm0, %v4887_v61, 0.0 }
 0x639   : > { %v4893_v48 = vpop.eup %3903  ;;  %v2146_v40 = vsel %vm1518_vm0, %v4889_v9, 0.0  ;;  %2144 = vadd.xlane.f32.xlu0 %v2143_v22 }
 0x63a   : > { %v4897_v51 = vpop.eup %3905  ;;  %v2123_v17 = vsub.f32 %v2062_v44, %v2118_v57  ;;  %v2124_v11 = vsub.f32 %v2065_v3, %v2118_v57  ;;  %v2125_v25 = vsub.f32 %v4877_v43, %v2118_v57  ;;  %v2126_v26 = vsub.f32 %v4879_v52, %v2118_v57  ;;  %2147 = vadd.xlane.f32.xlu1 %v2146_v40 }
 0x63b   : > { %v2149_v54 = vsel %vm1518_vm0, %v4893_v48, 0.0  ;;  %v2152_v2 = vsel %vm1518_vm0, %v4897_v51, 0.0  ;;  %v2167_v44 = vadd.f32 %v2146_v40, %v2143_v22 }
 0x63c   : > { %v2135_v27 = vmul.f32 1.442695, %v2123_v17  ;;  %v2137_v62 = vmul.f32 1.442695, %v2124_v11  ;;  %v2139_v28 = vmul.f32 1.442695, %v2125_v25 }
 0x63d   : > { %v2141_v34 = vmul.f32 1.442695, %v2126_v26  ;;  %2150 = vadd.xlane.f32.xlu0 %v2149_v54  ;;  %v2168_v43 = vadd.f32 %v2167_v44, %v2149_v54 }
 0x63e   : > { %3907 = vpow2.f32 %v2135_v27  ;;  %2153 = vadd.xlane.f32.xlu1 %v2152_v2 }
 0x63f   : > { %3909 = vpow2.f32 %v2137_v62  ;;  %v2169_v3 = vadd.f32 %v2168_v43, %v2152_v2 }
 0x640   : > { %3911 = vpow2.f32 %v2139_v28 }
 0x641   : > { %3913 = vpow2.f32 %v2141_v34  ;;  %v2170_v36 = vrot.slane %v2169_v3, 4 }
 0x643   : > { %v2171_v24 = vadd.f32 %v2170_v36, %v2169_v3 }
 0x645   : > { %v2172_v19 = vrot.slane %v2171_v24, 2 }
 0x647   : > { %v2173_v22 = vadd.f32 %v2172_v19, %v2171_v24 }
 0x648   : > { %v4905_v52 = vpop.eup %3907 }
 0x649   : > { %v4907_v53 = vpop.eup %3909  ;;  %v2155_v29 = vsel %vm1518_vm0, %v4905_v52, 0.0  ;;  %v2174_v17 = vrot.slane %v2173_v22, 1 }
 0x64a   : > { %v4911_v15 = vpop.eup %3911  ;;  %v2158_v56 = vsel %vm1518_vm0, %v4907_v53, 0.0  ;;  %2156 = vadd.xlane.f32.xlu0 %v2155_v29 }
 0x64b   : > { %v4915_v60 = vpop.eup %3913  ;;  %2159 = vadd.xlane.f32.xlu1 %v2158_v56  ;;  %v2176_v63 = vadd.f32 %v2158_v56, %v2155_v29  ;;  %v2161_v0 = vsel %vm1518_vm0, %v4911_v15, 0.0  ;;  %v2175_v25 = vadd.f32 %v2174_v17, %v2173_v22 }
 0x64c   : > { %v2164_v33 = vsel %vm1518_vm0, %v4915_v60, 0.0 }
 0x64d   : > { %v2177_v35 = vadd.f32 %v2176_v63, %v2161_v0  ;;  %v2209_v54 = vmax.f32 %v2175_v25, 1e-30 }
 0x64e   : > { %2162 = vadd.xlane.f32.xlu0 %v2161_v0 }
 0x64f   : > { %2165 = vadd.xlane.f32.xlu1 %v2164_v33  ;;  %v2178_v21 = vadd.f32 %v2177_v35, %v2164_v33  ;;  %3915 = vrcp.f32 %v2209_v54 }
 0x651   : > { %v2179_v16 = vrot.slane %v2178_v21, 4 }
 0x653   : > { %v2180_v18 = vadd.f32 %v2179_v16, %v2178_v21 }
 0x655   : > { %v2181_v57 = vrot.slane %v2180_v18, 2 }
 0x657   : > { %v2182_v40 = vadd.f32 %v2181_v57, %v2180_v18 }
 0x659   : > { %v2183_v11 = vrot.slane %v2182_v40, 1  ;;  %v3916_v62 = vpop.eup %3915 }
 0x65a   : > { %v2213_v34 = vmul.f32 %v3916_v62, %v4887_v61  ;;  %v2214_v2 = vmul.f32 %v3916_v62, %v4889_v9  ;;  %v2215_v29 = vmul.f32 %v3916_v62, %v4893_v48  ;;  %v2216_v56 = vmul.f32 %v3916_v62, %v4897_v51 }
 0x65b   : > { %v2184_v26 = vadd.f32 %v2183_v11, %v2182_v40 }
 0x65c   : > { %v2335_v3 = vpack.c.bf16 %v2214_v2, %v2213_v34  ;;  %v2336_v35 = vpack.c.bf16 %v2216_v56, %v2215_v29 }
 0x65d   : > { %v2210_v27 = vmax.f32 %v2184_v26, 1e-30 }
 0x65f   : > { %3917 = vrcp.f32 %v2210_v27 }
 0x669   : > { %v3918_v28 = vpop.eup %3917 }
 0x66a   : > { %v2217_v44 = vmul.f32 %v3918_v28, %v4905_v52  ;;  %v2218_v43 = vmul.f32 %v3918_v28, %v4907_v53  ;;  %v2219_v36 = vmul.f32 %v3918_v28, %v4911_v15  ;;  %v2220_v0 = vmul.f32 %v3918_v28, %v4915_v60 }
 0x66c   : > { %v2337_v63 = vpack.c.bf16 %v2218_v43, %v2217_v44  ;;  %v2338_v33 = vpack.c.bf16 %v2220_v0, %v2219_v36  ;;  %v3800_v0 = vld [vmem:[%s5245_s6 + $0x48] sm:$0xff]  }
 0x67b   : > { %2339 = vxpose.xlu0.c.b16.start [1/2] (short) (narrow) %v2335_v3, 32 }
 0x67c   : > { %2410 = vxpose.xlu1.c.b16.start [1/2] (short) (narrow) %v2337_v63, 32 }
 0x67f   : > { %2340 = vxpose.xlu0.c.b16.end [2/2] (short) (narrow) %v2336_v35, 32 }
 0x680   : > { %2411 = vxpose.xlu1.c.b16.end [2/2] (short) (narrow) %v2338_v33, 32 }
 0x6c6   : > { %v2145_v21 = vpop.xlane.xlu0 %2144 }
 0x6c7   : > { %v2185_v24 = vmax.f32 %v2145_v21, 1e-30  ;;  %v2148_v16 = vpop.xlane.xlu1 %2147 }
 0x6c8   : > { %v2186_v18 = vmax.f32 %v2148_v16, 1e-30 }
 0x6c9   : > { %3919 = vrcp.f32 %v2185_v24 }
 0x6ca   : > { %3921 = vrcp.f32 %v2186_v18  ;;  %v2151_v19 = vpop.xlane.xlu0 %2150 }
 0x6cb   : > { %v2187_v57 = vmax.f32 %v2151_v19, 1e-30  ;;  %v2154_v22 = vpop.xlane.xlu1 %2153 }
 0x6cc   : > { %v2188_v40 = vmax.f32 %v2154_v22, 1e-30 }
 0x6cd   : > { %3923 = vrcp.f32 %v2187_v57 }
 0x6ce   : > { %3925 = vrcp.f32 %v2188_v40 }
 0x6d3   : > { %v3920_v17 = vpop.eup %3919 }
 0x6d4   : > { %v3922_v11 = vpop.eup %3921  ;;  %v2201_v25 = vmul.f32 %v3920_v17, %v4887_v61  ;;  %v3807_v17 = vld [vmem:[%s5245_s6 + $0x68] sm:$0xff]  }
 0x6d5   : > { %v2202_v26 = vmul.f32 %v3922_v11, %v4889_v9  ;;  %v3809_v11 = vld [vmem:[%s5245_s6 + $0x70] sm:$0xff]  }
 0x6d7   : > { %v3924_v54 = vpop.eup %3923  ;;  %v2157_v27 = vpop.xlane.xlu0 %2156  ;;  %v2221_v62 = vpack.c.bf16 %v2202_v26, %v2201_v25  ;;  %v3808_v25 = vld [vmem:[%s5247_s8 + $0x58] sm:$0xff]   ;;  %v3810_v26 = vld [vmem:[%s5247_s8 + $0x60] sm:$0xff]  }
 0x6d8   : > { %v3926_v28 = vpop.eup %3925  ;;  %v2203_v34 = vmul.f32 %v3924_v54, %v4893_v48  ;;  %v2189_v2 = vmax.f32 %v2157_v27, 1e-30  ;;  %v2160_v44 = vpop.xlane.xlu1 %2159  ;;  %v3799_v48 = vld [vmem:[%s5245_s6 + $0x40] sm:$0xff]   ;;  %v3811_v54 = vld [vmem:[%s5245_s6 + $0x78] sm:$0xff]   ;;  %v3812_v27 = vld [vmem:[%s5247_s8 + $0x68] sm:$0xff]  }
 0x6d9   : > { %v2204_v43 = vmul.f32 %v3926_v28, %v4897_v51  ;;  %v2190_v3 = vmax.f32 %v2160_v44, 1e-30  ;;  %3516 = vmatprep.mubr.msk.bf16.mxu0 %vm1518_vm0, %v2221_v62  ;;  %v3813_v62 = vld [vmem:[%s5245_s6] sm:$0xff]   ;;  %v3814_v28 = vld [vmem:[%s5247_s8 + $0x70] sm:$0xff]  }
 0x6da   : > { %3927 = vrcp.f32 %v2189_v2  ;;  %v3818_v2 = vld [vmem:[%s5247_s8] sm:$0xff]  }
 0x6db   : > { %3929 = vrcp.f32 %v2190_v3  ;;  %v2163_v29 = vpop.xlane.xlu0 %2162  ;;  %v2222_v56 = vpack.c.bf16 %v2204_v43, %v2203_v34  ;;  %v3816_v34 = vld [vmem:[%s5247_s8 + $0x78] sm:$0xff]  }
 0x6dc   : > { %v2191_v61 = vmax.f32 %v2163_v29, 1e-30  ;;  %v2166_v63 = vpop.xlane.xlu1 %2165 }
 0x6dd   : > { %v2192_v9 = vmax.f32 %v2166_v63, 1e-30  ;;  %3517 = vmatmul.mubr.msk.bf16.vlgmr.msra.gmra.mrb[48].mxu0 %vm1518_vm0, %v2222_v56  ;;  %v3815_v63 = vld [vmem:[%s5245_s6 + $0x8] sm:$0xff]  }
 0x6de   : > { %3931 = vrcp.f32 %v2191_v61  ;;  %3529 = vmatpush3.bf16.msra.mxu0 %v4574_v37 }
 0x6df   : > { %3933 = vrcp.f32 %v2192_v9  ;;  %3530 = vmatprep.subr.bf16.mxu0 %v4598_v31 }
 0x6e1   : > { %v2347_v51 = vpop.trf.xlu0 }
 0x6e2   : > { %3531 = vmatpush3.bf16.msra.mxu0 %v4598_v31  ;;  %3532 = vmatprep.mubr.msk.bf16.mxu0 %vm1518_vm0, %v2347_v51  ;;  %v3801_v31 = vld [vmem:[%s5245_s6 + $0x50] sm:$0xff]   ;;  %v2418_v22 = vpop.trf.xlu1 }
 0x6e3   : > { %3544 = vmatprep.subr.bf16.mxu0 %v3799_v48 }
 0x6e4   : > { %v3928_v36 = vpop.eup %3927 }
 0x6e5   : > { %v3930_v35 = vpop.eup %3929  ;;  %v2348_v37 = vpop.trf.xlu0  ;;  %v2205_v33 = vmul.f32 %v3928_v36, %v4905_v52 }
 0x6e6   : > { %3533 = vmatmul.mubr.msk.bf16.vlgmr.msra.gmra.mrb[52].mxu0 %vm1518_vm0, %v2348_v37  ;;  %v2206_v21 = vmul.f32 %v3930_v35, %v4907_v53  ;;  %v3803_v53 = vld [vmem:[%s5245_s6 + $0x58] sm:$0xff]   ;;  %v2419_v40 = vpop.trf.xlu1 }
 0x6e7   : > { %3545 = vmatpush3.bf16.msra.mxu0 %v3799_v48  ;;  %v3817_v48 = vld [vmem:[%s5245_s6 + $0x10] sm:$0xff]  }
 0x6e8   : > { %v3932_v24 = vpop.eup %3931  ;;  %v2223_v16 = vpack.c.bf16 %v2206_v21, %v2205_v33  ;;  %3546 = vmatprep.subr.bf16.mxu0 %v3800_v0  ;;  %v3819_v33 = vld [vmem:[%s5245_s6 + $0x18] sm:$0xff]   ;;  %v3820_v21 = vld [vmem:[%s5247_s8 + $0x8] sm:$0xff]  }
 0x6e9   : > { %v3934_v18 = vpop.eup %3933  ;;  %v2207_v19 = vmul.f32 %v3932_v24, %v4911_v15  ;;  %v3802_v15 = vld [vmem:[%s5247_s8 + $0x40] sm:$0xff]  }
 0x6ea   : > { %v2208_v57 = vmul.f32 %v3934_v18, %v4915_v60  ;;  %3524 = vmatprep.mubr.msk.bf16.mxu1 %vm1518_vm0, %v2223_v16  ;;  %v3805_v60 = vld [vmem:[%s5245_s6 + $0x60] sm:$0xff]   ;;  %v3822_v18 = vld [vmem:[%s5247_s8 + $0x10] sm:$0xff]  }
 0x6eb   : > { %3547 = vmatpush3.bf16.msra.mxu0 %v3800_v0  ;;  %v3821_v16 = vld [vmem:[%s5245_s6 + $0x20] sm:$0xff]  }
 0x6ec   : > { %v2224_v52 = vpack.c.bf16 %v2208_v57, %v2207_v19  ;;  %3548 = vmatprep.subr.bf16.mxu0 %v3801_v31 }
 0x6ee   : > { %3525 = vmatmul.mubr.msk.bf16.vlgmr.msra.gmra.mrb[48].mxu1 %vm1518_vm0, %v2224_v52 }
 0x6ef   : > { %3537 = vmatpush3.bf16.msra.mxu1 %v4616_v10  ;;  %3540 = vmatprep.mubr.msk.bf16.mxu1 %vm1518_vm0, %v2418_v22  ;;  %v3804_v10 = vld [vmem:[%s5247_s8 + $0x48] sm:$0xff]  }
 0x6f0   : > { %3538 = vmatprep.subr.bf16.mxu1 %v4643_v47  ;;  %3549 = vmatpush3.bf16.msra.mxu0 %v3801_v31 }
 0x6f1   : > { %3550 = vmatprep.subr.bf16.mxu0 %v3803_v53 }
 0x6f3   : > { %3539 = vmatpush3.bf16.msra.mxu1 %v4643_v47  ;;  %v3806_v47 = vld [vmem:[%s5247_s8 + $0x50] sm:$0xff]  }
 0x6f4   : > { %3592 = vmatprep.subr.bf16.mxu1 %v3802_v15  ;;  %3551 = vmatpush3.bf16.msra.mxu0 %v3803_v53  ;;  %v3823_v53 = vld [vmem:[%s5245_s6 + $0x28] sm:$0xff]  }
 0x6f5   : > { %3552 = vmatprep.subr.bf16.mxu0 %v3805_v60 }
 0x6f6   : > { %3541 = vmatmul.mubr.msk.bf16.vlgmr.msra.gmra.mrb[52].mxu1 %vm1518_vm0, %v2419_v40 }
 0x6f7   : > { %3593 = vmatpush3.bf16.msra.mxu1 %v3802_v15  ;;  %v3824_v15 = vld [vmem:[%s5247_s8 + $0x18] sm:$0xff]  }
 0x6f8   : > { %3594 = vmatprep.subr.bf16.mxu1 %v3804_v10  ;;  %3553 = vmatpush3.bf16.msra.mxu0 %v3805_v60 }
 0x6f9   : > { %3554 = vmatprep.subr.bf16.mxu0 %v3807_v17 }
 0x6fb   : > { %3595 = vmatpush3.bf16.msra.mxu1 %v3804_v10  ;;  %v3825_v10 = vld [vmem:[%s5245_s6 + $0x30] sm:$0xff]  }
 0x6fc   : > { %3596 = vmatprep.subr.bf16.mxu1 %v3806_v47  ;;  %3555 = vmatpush3.bf16.msra.mxu0 %v3807_v17 }
 0x6fd   : > { %3556 = vmatprep.subr.bf16.mxu0 %v3809_v11 }
 0x6ff   : > { %3597 = vmatpush3.bf16.msra.mxu1 %v3806_v47  ;;  %v3826_v47 = vld [vmem:[%s5247_s8 + $0x20] sm:$0xff]  }
 0x700   : > { %3598 = vmatprep.subr.bf16.mxu1 %v3808_v25  ;;  %3557 = vmatpush3.bf16.msra.mxu0 %v3809_v11 }
 0x701   : > { %3558 = vmatprep.subr.bf16.mxu0 %v3811_v54 }
 0x703   : > { %3599 = vmatpush3.bf16.msra.mxu1 %v3808_v25 }
 0x704   : > { %3600 = vmatprep.subr.bf16.mxu1 %v3810_v26  ;;  %3559 = vmatpush3.bf16.msra.mxu0 %v3811_v54  ;;  %v3830_v54 = vld [vmem:[%s5247_s8 + $0x38] sm:$0xff]  }
 0x705   : > { %3568 = vmatprep.subr.bf16.mxu0 %v3813_v62 }
 0x707   : > { %3601 = vmatpush3.bf16.msra.mxu1 %v3810_v26 }
 0x708   : > { %3602 = vmatprep.subr.bf16.mxu1 %v3812_v27 }
 0x70b   : > { %3603 = vmatpush3.bf16.msra.mxu1 %v3812_v27  ;;  %v3938_v27 = vld [vmem:[%s4174_s24 + $0x8] sm:$0xff] }
 0x70c   : > { %3604 = vmatprep.subr.bf16.mxu1 %v3814_v28 }
 0x70f   : > { %3605 = vmatpush3.bf16.msra.mxu1 %v3814_v28 }
 0x710   : > { %3606 = vmatprep.subr.bf16.mxu1 %v3816_v34 }
 0x713   : > { %3607 = vmatpush3.bf16.msra.mxu1 %v3816_v34 }
 0x714   : > { %3616 = vmatprep.subr.bf16.mxu1 %v3818_v2 }
 0x7b0   : > { %v3518_v44 = vpop.f32.mrb[48].mxu0 }
 0x7b1   : > { %v2265_v43 = vpop.f32.mrb[49].mxu0 }
 0x7b2   : > { %v3519_v3 = vpop.f32.mrb[50].mxu0 }
 0x7b3   : > { %v2482_v29 = vpack.c.bf16 %v3519_v3, %v3518_v44  ;;  %v2268_v56 = vpop.f32.mrb[51].mxu0 }
 0x7b4   : > { %v2481_v61 = vpack.c.bf16 %v2268_v56, %v2265_v43  ;;  %v5100_v43 = vld [vmem:[%s5250_s11] ss:$0 sm:$0xff] }
 0x7b6   : > { %3560 = vmatprep.mubr.bf16.mxu0 %v2481_v61 }
 0x7b7   : > { %3561 = vmatmul.mubr.bf16.vlgmr.msra.gmra.mrb[56].mxu0 %v2482_v29 }
 0x7b8   : > { %3569 = vmatpush3.bf16.msra.mxu0 %v3813_v62 }
 0x7b9   : > { %v3534_v9 = vpop.f32.mrb[52].mxu0  ;;  %3570 = vmatprep.subr.bf16.mxu0 %v3815_v63 }
 0x7ba   : > { %v2395_v51 = vpop.f32.mrb[53].mxu0 }
 0x7bb   : > { %v3535_v36 = vpop.f32.mrb[54].mxu0 }
 0x7bc   : > { %v2728_v0 = vpack.c.bf16 %v3535_v36, %v3534_v9  ;;  %3571 = vmatpush3.bf16.msra.mxu0 %v3815_v63  ;;  %v2398_v35 = vpop.f32.mrb[55].mxu0 }
 0x7bd   : > { %v2727_v37 = vpack.c.bf16 %v2398_v35, %v2395_v51  ;;  %3572 = vmatprep.subr.bf16.mxu0 %v3817_v48 }
 0x7bf   : > { %3608 = vmatprep.mubr.bf16.mxu1 %v2727_v37 }
 0x7c0   : > { %3573 = vmatpush3.bf16.msra.mxu0 %v3817_v48  ;;  %3609 = vmatmul.mubr.bf16.vlgmr.msra.gmra.mrb[56].mxu1 %v2728_v0 }
 0x7c1   : > { %v3526_v24 = vpop.f32.mrb[48].mxu1  ;;  %3617 = vmatpush3.bf16.msra.mxu1 %v3818_v2  ;;  %3574 = vmatprep.subr.bf16.mxu0 %v3819_v33 }
 0x7c2   : > { %v2320_v31 = vpop.f32.mrb[49].mxu1  ;;  %3618 = vmatprep.subr.bf16.mxu1 %v3820_v21 }
 0x7c3   : > { %v3527_v19 = vpop.f32.mrb[50].mxu1 }
 0x7c4   : > { %v2484_v57 = vpack.c.bf16 %v3527_v19, %v3526_v24  ;;  %v2323_v52 = vpop.f32.mrb[51].mxu1  ;;  %3575 = vmatpush3.bf16.msra.mxu0 %v3819_v33  ;;  %v3939_v24 = vld [vmem:[%s4174_s24 + $0x30] sm:$0xff] }
 0x7c5   : > { %v2483_v22 = vpack.c.bf16 %v2323_v52, %v2320_v31  ;;  %3619 = vmatpush3.bf16.msra.mxu1 %v3820_v21  ;;  %3576 = vmatprep.subr.bf16.mxu0 %v3821_v16 }
 0x7c6   : > { %3620 = vmatprep.subr.bf16.mxu1 %v3822_v18 }
 0x7c7   : > { %3564 = vmatprep.mubr.bf16.mxu0 %v2483_v22  ;;  %v3941_v22 = vld [vmem:[%s4197_s16 + $0x10] sm:$0xff] }
 0x7c8   : > { %3565 = vmatmul.mubr.bf16.gmra.mrb[60].mxu0 %v2484_v57  ;;  %v3940_v57 = vld [vmem:[%s4174_s24 + $0x20] sm:$0xff] }
 0x7c9   : > { %3577 = vmatpush3.bf16.msra.mxu0 %v3821_v16  ;;  %v3542_v60 = vpop.f32.mrb[52].mxu1  ;;  %3584 = vmatprep.mubr.bf16.mxu0 %v1923_v4  ;;  %v3829_v4 = vld [vmem:[%s5247_s8 + $0x30] sm:$0xff]  }
 0x7ca   : > { %3621 = vmatpush3.bf16.msra.mxu1 %v3822_v18  ;;  %v2466_v40 = vpop.f32.mrb[53].mxu1  ;;  %3578 = vmatprep.subr.bf16.mxu0 %v3823_v53 }
 0x7cb   : > { %v3543_v17 = vpop.f32.mrb[54].mxu1  ;;  %3622 = vmatprep.subr.bf16.mxu1 %v3824_v15 }
 0x7cc   : > { %v2730_v11 = vpack.c.bf16 %v3543_v17, %v3542_v60  ;;  %v2469_v25 = vpop.f32.mrb[55].mxu1  ;;  %v3943_v17 = vld [vmem:[%s4197_s16] sm:$0xff] }
 0x7cd   : > { %v2729_v26 = vpack.c.bf16 %v2469_v25, %v2466_v40  ;;  %3579 = vmatpush3.bf16.msra.mxu0 %v3823_v53  ;;  %v3942_v40 = vld [vmem:[%s4174_s24 + $0x38] sm:$0xff]  ;;  %v3944_v25 = vld [vmem:[%s4174_s24 + $0x28] sm:$0xff] }
 0x7ce   : > { %3623 = vmatpush3.bf16.msra.mxu1 %v3824_v15  ;;  %3580 = vmatprep.subr.bf16.mxu0 %v3825_v10 }
 0x7cf   : > { %3612 = vmatprep.mubr.bf16.mxu1 %v2729_v26  ;;  %3624 = vmatprep.subr.bf16.mxu1 %v3826_v47 }
 0x7d0   : > { %3613 = vmatmul.mubr.bf16.gmra.mrb[60].mxu1 %v2730_v11 }
 0x7d1   : > { %3581 = vmatpush3.bf16.msra.mxu0 %v3825_v10  ;;  %3632 = vmatprep.mubr.bf16.mxu1 %v1943_v42 }
 0x7d2   : > { %3625 = vmatpush3.bf16.msra.mxu1 %v3826_v47  ;;  %3582 = vmatprep.subr.bf16.mxu0 %v3827_v30 }
 0x7d3   : > { %3626 = vmatprep.subr.bf16.mxu1 %v3828_v55 }
 0x7d5   : > { %3583 = vmatpush3.bf16.msra.mxu0 %v3827_v30  ;;  %v3945_v30 = vld [vmem:[%s4197_s16 + $0x18] sm:$0xff] }
 0x7d6   : > { %3627 = vmatpush3.bf16.msra.mxu1 %v3828_v55 }
 0x7d7   : > { %3628 = vmatprep.subr.bf16.mxu1 %v3829_v4 }
 0x7d8   : > { %3585 = vmatmul.mubr.bf16.vlgmr.msra.gmra.mrb[56].mxu0 %v1924_v38  ;;  %v3334_v38 = vld [vmem:[%s5249_s10] ss:$0 sm:$0xff] }
 0x7d9   : > { %3588 = vmatprep.mubr.bf16.mxu0 %v1925_v12 }
 0x7da   : > { %3629 = vmatpush3.bf16.msra.mxu1 %v3829_v4  ;;  %v3946_v4 = vld [vmem:[%s4197_s16 + $0x8] sm:$0xff] }
 0x7db   : > { %3630 = vmatprep.subr.bf16.mxu1 %v3830_v54 }
 0x7de   : > { %3631 = vmatpush3.bf16.msra.mxu1 %v3830_v54 }
 0x7e0   : > { %3589 = vmatmul.mubr.bf16.gmra.mrb[60].mxu0 %v1926_v59  ;;  %v3935_v59 = vld [vmem:[%s4174_s24 + $0x10] sm:$0xff] }
 0x7e1   : > { %3633 = vmatmul.mubr.bf16.vlgmr.msra.gmra.mrb[56].mxu1 %v1944_v41 }
 0x7e2   : > { %3636 = vmatprep.mubr.bf16.mxu1 %v1945_v39  ;;  %v5092_v39 = vld [vmem:[%s5248_s9] ss:$0 sm:$0xff] }
 0x7e9   : > { %3637 = vmatmul.mubr.bf16.gmra.mrb[60].mxu1 %v1946_v23  ;;  %v3937_v23 = vld [vmem:[%s4174_s24 + $0x18] sm:$0xff]  ;;  %s3066_s24 = scalar_lea.sflag [#allocation3], %s5072_s0 }
 0x8ab   : > { %v3586_v50 = vpop.f32.mrb[56].mxu0 }
 0x8ac   : > { %v2982_v7 = vadd.f32 %v3586_v50, %v3332_v13  ;;  %v2696_v45 = vpop.f32.mrb[57].mxu0 }
 0x8ad   : > { %v2980_v20 = vadd.f32 %v3332_v13, %v2696_v45  ;;  %v3587_v41 = vpop.f32.mrb[58].mxu0 }
 0x8ae   : > { %v3012_v14 = vmul.f32 %v3334_v38, %v2982_v7  ;;  %v2983_v42 = vadd.f32 %v3587_v41, %v3332_v13  ;;  %v2699_v8 = vpop.f32.mrb[59].mxu0 }
 0x8af   : > { %v3010_v5 = vmul.f32 %v3334_v38, %v2980_v20  ;;  %v2981_v46 = vadd.f32 %v3332_v13, %v2699_v8 }
 0x8b0   : > { %v3020_v58 = vadd.f32 %v3935_v59, %v3012_v14  ;;  %v3013_v12 = vmul.f32 %v3334_v38, %v2983_v42 }
 0x8b1   : > { %v3018_v6 = vadd.f32 %v3936_v32, %v3010_v5  ;;  %v3011_v1 = vmul.f32 %v3334_v38, %v2981_v46 }
 0x8b2   : > { %3028 = vst [vmem:[%s5085_s30 + $0x10] sm:$0xff] %v3020_v58  ;;  %v3021_v49 = vadd.f32 %v3937_v23, %v3013_v12 }
 0x8b3   : > { %3026 = vst [vmem:[%s5085_s30] sm:$0xff] %v3018_v6  ;;  %v3019_v62 = vadd.f32 %v3938_v27, %v3011_v1  ;;  %v3590_v28 = vpop.f32.mrb[60].mxu0 }
 0x8b4   : > { %3029 = vst [vmem:[%s5085_s30 + $0x18] sm:$0xff] %v3021_v49  ;;  %v2986_v34 = vadd.f32 %v3590_v28, %v3332_v13  ;;  %v2712_v2 = vpop.f32.mrb[61].mxu0  ;;  %v3634_v44 = vpop.f32.mrb[56].mxu1 }
 0x8b5   : > { %3027 = vst [vmem:[%s5085_s30 + $0x8] sm:$0xff] %v3019_v62  ;;  %v2984_v3 = vadd.f32 %v3332_v13, %v2712_v2  ;;  %v2997_v29 = vadd.f32 %v3634_v44, %v5092_v39  ;;  %v3591_v56 = vpop.f32.mrb[62].mxu0  ;;  %v2942_v61 = vpop.f32.mrb[57].mxu1 }
 0x8b6   : > { %v3016_v63 = vmul.f32 %v3334_v38, %v2986_v34  ;;  %v2987_v9 = vadd.f32 %v3591_v56, %v3332_v13  ;;  %v2995_v48 = vadd.f32 %v5092_v39, %v2942_v61  ;;  %v2715_v51 = vpop.f32.mrb[63].mxu0  ;;  %v3635_v36 = vpop.f32.mrb[58].mxu1 }
 0x8b7   : > { %v3014_v0 = vmul.f32 %v3334_v38, %v2984_v3  ;;  %v3043_v35 = vmul.f32 %v5100_v43, %v2997_v29  ;;  %v2985_v37 = vadd.f32 %v3332_v13, %v2715_v51  ;;  %v2998_v33 = vadd.f32 %v3635_v36, %v5092_v39  ;;  %v2945_v21 = vpop.f32.mrb[59].mxu1 }
 0x8b8   : > { %v3024_v16 = vadd.f32 %v3939_v24, %v3016_v63  ;;  %v3017_v31 = vmul.f32 %v3334_v38, %v2987_v9  ;;  %v3041_v18 = vmul.f32 %v5100_v43, %v2995_v48  ;;  %v2996_v19 = vadd.f32 %v5092_v39, %v2945_v21 }
 0x8b9   : > { %v3022_v52 = vadd.f32 %v3940_v57, %v3014_v0  ;;  %v3051_v53 = vadd.f32 %v3941_v22, %v3043_v35  ;;  %v3015_v15 = vmul.f32 %v3334_v38, %v2985_v37  ;;  %v3044_v60 = vmul.f32 %v5100_v43, %v2998_v33 }
 0x8ba   : > { %3032 = vst [vmem:[%s5085_s30 + $0x30] sm:$0xff] %v3024_v16  ;;  %v3025_v10 = vadd.f32 %v3942_v40, %v3017_v31  ;;  %v3049_v47 = vadd.f32 %v3943_v17, %v3041_v18  ;;  %v3042_v11 = vmul.f32 %v5100_v43, %v2996_v19 }
 0x8bb   : > { %3030 = vst [vmem:[%s5085_s30 + $0x20] sm:$0xff] %v3022_v52  ;;  %3059 = vst [vmem:[%s5131_s15 + $0x10] sm:$0xff] %v3051_v53  ;;  %v3023_v26 = vadd.f32 %v3944_v25, %v3015_v15  ;;  %v3052_v55 = vadd.f32 %v3945_v30, %v3044_v60 }
 0x8bc   : > { %3033 = vst [vmem:[%s5085_s30 + $0x38] sm:$0xff] %v3025_v10  ;;  %3057 = vst [vmem:[%s5131_s15] sm:$0xff] %v3049_v47  ;;  %v3050_v54 = vadd.f32 %v3946_v4, %v3042_v11  ;;  %v3638_v13 = vpop.f32.mrb[60].mxu1 }
 0x8bd   : > { %3031 = vst [vmem:[%s5085_s30 + $0x28] sm:$0xff] %v3023_v26  ;;  %3060 = vst [vmem:[%s5131_s15 + $0x18] sm:$0xff] %v3052_v55  ;;  %v3001_v50 = vadd.f32 %v3638_v13, %v5092_v39  ;;  %v2958_v38 = vpop.f32.mrb[61].mxu1 }
 0x8be   : > { %3058 = vst [vmem:[%s5131_s15 + $0x8] sm:$0xff] %v3050_v54  ;;  %v2999_v7 = vadd.f32 %v5092_v39, %v2958_v38  ;;  %v3639_v45 = vpop.f32.mrb[62].mxu1 }
 0x8bf   : > { %3964 = shalt.err (!%p3961_p3)
}
 0x8c0   : > { %s3965_s30 = scalar_lea.hbm %s5124_s17, 1024  ;;  %s3969_s20 = scalar_lea.hbm %s5251_s12, 2048 }
 0x8c1   : > { %p3966_p4 = scmp.ne.s32.totalorder %s5124_s17, %s3965_s30  ;;  %p3970_p9 = scmp.lt.u32.totalorder %s5124_s17, %s5251_s12 }
 0x8c2   : > { %p3971_p10 = scmp.lt.u32.totalorder %s3969_s20, %s3965_s30  ;;  %p3973_p12 = scmp.lt.u32.totalorder %s3965_s30, %s5124_s17 }
 0x8c3   : > { %p3967_p7 = pnand %p3966_p4, %p4160_p5 }
 0x8c4   : > { %p3972_p11 = por %p3971_p10, %p3970_p9 }
 0x8c5   : > { %p3968_p8 = pneg %p3967_p7 }
 0x8c6   : > { %p3974_p13 = por %p3973_p12, %p3972_p11 }
 0x8c8   : > { %p3975_p0 = pnand %p3974_p13, %p3968_p8 }
 0x8ca   : > { %3978 = shalt.err (!%p3975_p0)
}
 0x8cb   : > { %s4049_s19 = smov 128   ;;  %s4050_s22 = smov 8   ;;  %v3047_v20 = vmul.f32 %v5100_v43, %v3001_v50  ;;  %v3002_v41 = vadd.f32 %v3639_v45, %v5092_v39  ;;  %v2961_v14 = vpop.f32.mrb[63].mxu1  ;;  %v3045_v42 = vmul.f32 %v5100_v43, %v2999_v7  ;;  %v3947_v5 = vld [vmem:[%s4197_s16 + $0x30] sm:$0xff]  ;;  %v3948_v58 = vld [vmem:[%s4197_s16 + $0x20] sm:$0xff]  ;;  %v3949_v6 = vld [vmem:[%s4197_s16 + $0x38] sm:$0xff] }
 0x8cc   : > { %3656 = dma.vmem_to_hbm [thread:$0]  (%p4160_p5), %s5126_s1, 1024, %s5124_s17, %s3066_s24, %s4049_s19, %s4049_s19, %s4050_s22   ;;  %v3000_v8 = vadd.f32 %v5092_v39, %v2961_v14 }
 0x8cd   : > { %v3055_v46 = vadd.f32 %v3947_v5, %v3047_v20  ;;  %v3048_v59 = vmul.f32 %v5100_v43, %v3002_v41  ;;  %s3102_s23 = sshll.u32 %s5131_s15, 4  ;;  %v3053_v12 = vadd.f32 %v3948_v58, %v3045_v42  ;;  %v3950_v23 = vld [vmem:[%s4197_s16 + $0x28] sm:$0xff]  ;;  %s5268_s1 = sshll.u32 %s4143_s29, 10  ;;  %s5191_s23 = int_to_ptr.vmem [resolvable:$true] %s3102_s23 }
 0x8ce   : > { %v3046_v32 = vmul.f32 %v5100_v43, %v3000_v8  ;;  %s5189_s30 = scalar_lea.hbm %s5252_s13, %s5268_s1  ;;  %s3071_s27 = scalar_lea.sflag [#allocation5], %s5072_s0 }
 0x8cf   : > { %3063 = vst [vmem:[%s5131_s15 + $0x30] sm:$0xff] %v3055_v46  ;;  %v3056_v1 = vadd.f32 %v3949_v6, %v3048_v59  ;;  %3061 = vst [vmem:[%s5131_s15 + $0x20] sm:$0xff] %v3053_v12  ;;  %s3979_s14 = scalar_lea.vmem %s5191_s23, 1024  ;;  %s4051_s16 = smov [#allocation4]  }
 0x8d0   : > { %v3054_v49 = vadd.f32 %v3950_v23, %v3046_v32  ;;  %p3980_p1 = scmp.ne.s32.totalorder %s5191_s23, %s3979_s14  ;;  %s3983_s29 = sshll.u32 %s4051_s16, 4  ;;  %s3984_s29 = int_to_ptr.vmem [resolvable:$false] %s3983_s29 }
 0x8d1   : > { %3064 = vst [vmem:[%s5131_s15 + $0x38] sm:$0xff] %v3056_v1  ;;  %s3985_s20 = scalar_lea.vmem %s3984_s29, 2048  ;;  %p3986_p4 = scmp.lt.s32.totalorder %s5191_s23, %s3984_s29 }
 0x8d2   : > { %3062 = vst [vmem:[%s5131_s15 + $0x28] sm:$0xff] %v3054_v49  ;;  %p3981_p2 = pnand %p3980_p1, %p4160_p5  ;;  %p3987_p7 = scmp.lt.s32.totalorder %s3985_s20, %s3979_s14 }
 0x8d4   : > { %p3982_p3 = pneg %p3981_p2  ;;  %p3988_p8 = por %p3987_p7, %p3986_p4 }
 0x8d6   : > { %p3989_p9 = pnand %p3988_p8, %p3982_p3 }
 0x8d8   : > { %3992 = shalt.err (!%p3989_p9)
}
 0x8d9   : > { %s3993_s15 = scalar_lea.hbm %s5189_s30, 1024  ;;  %s3997_s17 = scalar_lea.hbm %s5252_s13, 2048 }
 0x8da   : > { %p3994_p10 = scmp.ne.s32.totalorder %s5189_s30, %s3993_s15  ;;  %p3998_p13 = scmp.lt.u32.totalorder %s5189_s30, %s5252_s13 }
 0x8db   : > { %p3999_p0 = scmp.lt.u32.totalorder %s3997_s17, %s3993_s15  ;;  %p4001_p2 = scmp.lt.u32.totalorder %s3993_s15, %s5189_s30 }
 0x8dc   : > { %p3995_p11 = pnand %p3994_p10, %p4160_p5 }
 0x8dd   : > { %p4000_p1 = por %p3999_p0, %p3998_p13 }
 0x8de   : > { %p3996_p12 = pneg %p3995_p11 }
 0x8df   : > { %p4002_p3 = por %p4001_p2, %p4000_p1 }
 0x8e1   : > { %p4003_p4 = pnand %p4002_p3, %p3996_p12 }
 0x8e3   : > { %4006 = shalt.err (!%p4003_p4)
}
 0x8e4   : > { %3657 = dma.vmem_to_hbm [thread:$0]  (%p4160_p5), %s5191_s23, 1024, %s5189_s30, %s3071_s27, %s4049_s19, %s4049_s19, %s4050_s22  }
 0x8e5 PF: > { %p3667_p7 = scmp.ge.s32.totalorder %s4045_s28, 2  ;;  %s3117_s29 = sand.u32 1, %s4033_s25  }
 0x8e6   : > { %s3118_s20 = scalar_lea.sflag [#allocation3], %s3117_s29 }
 0x8e7   : > { %p3661_p8 = pnand %p3667_p7, %p4164_p6 }
 0x8e9   : > { %4024 = dma.done.wait (!%p3661_p8), %s3118_s20, 1024  }
 0x8ea   : > { %4026 = vsyncadd (!%p3661_p8), %s3118_s20, 4294966272  ;;  %s3127_s18 = scalar_lea.sflag [#allocation5], %s3117_s29 }
 0x8eb   : > { %4028 = dma.done.wait (!%p3661_p8), %s3127_s18, 1024  }
 0x8ec   : > { %4030 = vsyncadd (!%p3661_p8), %s3127_s18, 4294966272  ;;  %s5270_s28 = sld [smem:[#allocation9_spill]]  ;;  %s5271_s0 = sld [smem:[#allocation8_spill]] }
 0x8ed   : > { %s5272_s27 = sld [smem:[#allocation10_spill]]  ;;  %s5273_s25 = smov %s4037_s26 }
 0x8f2   : > { %p27_p5 = scmp.ge.s32.totalorder %s5270_s28, 4   ;;  %s5274_s26 = smov %s5271_s0 }
 0x8f4   :  { %29 = sbr.rel (!%p27_p5) target bundleno = 8 (0x8), region = 123 }
 0x8fb   :  { %3132 = vsyncpa [#allocation3], 1 }
 0x8fc   :  { %3134 = vsyncpa [#allocation3 + $0x1], 1 }
 0x8fd   :  { %3135 = vsyncpa [#allocation5], 1 }
 0x8fe   :  { %3137 = vsyncpa [#allocation5 + $0x1], 1 }

</bundles_post_ra>
